<compile_context>
chip_gen: v5e
topology: v5e:2x2
jax: 0.10.0
libtpu: 0.0.40
codegen_flags: <defaults>
</compile_context>

<pallas_src>
import functools
import math

import jax
import jax.numpy as jnp
from jax.experimental import pallas as pl
from jax.experimental.pallas import tpu as pltpu


# ----------------------------------------------------------------------------
# elementwise helpers (shared by kernel and reference so the formulas match)
# ----------------------------------------------------------------------------
def _sigmoid(x):
    return 1.0 / (1.0 + jnp.exp(-x))


def _silu(x):
    return x * _sigmoid(x)


def _softplus(x):
    # numerically stable softplus; matches F.softplus(beta=1) to ~1e-9
    return jnp.maximum(x, 0.0) + jnp.log(1.0 + jnp.exp(-jnp.abs(x)))


# ----------------------------------------------------------------------------
# Pallas kernel: one fused Mamba block, grid = (batch, seq_chunks)
# ----------------------------------------------------------------------------
def mamba_block_kernel(x_ref, w_in_ref, conv_w_ref, conv_b_ref, w_xproj_ref,
                       a_ref, d_ref, w_out_ref,
                       out_ref, hlast_ref,
                       xpad_buf, h_state, da_buf, bh_buf,
                       *, d_conv, d_state, dt_rank, matmul_dtype):
    chunk = pl.program_id(1)
    ts = out_ref.shape[1]                      # timesteps in this chunk
    d_inner = d_ref.shape[1]

    # reset carried state at the start of every batch element
    @pl.when(chunk == 0)
    def _():
        h_state[...] = jnp.zeros_like(h_state)
        xpad_buf[0:d_conv - 1, :] = jnp.zeros((d_conv - 1, d_inner), jnp.float32)

    # ---- in_proj (MXU: bf16 in / f32 acc), split into x branch and gate z ----
    x = x_ref[0].astype(matmul_dtype)                           # (ts, d_model)
    xz = jnp.dot(x, w_in_ref[...], preferred_element_type=jnp.float32)
    x_in = xz[:, 0:d_inner]                                     # (ts, d_inner)
    z = xz[:, d_inner:2 * d_inner]                              # (ts, d_inner)

    # ---- causal depthwise conv1d (halo from previous chunk lives in xpad_buf) ----
    xpad_buf[d_conv - 1:, :] = x_in
    x_conv = jnp.broadcast_to(conv_b_ref[...], (ts, d_inner))
    for k in range(d_conv):                                     # small static loop
        x_conv = x_conv + xpad_buf[k:k + ts, :] * conv_w_ref[k:k + 1, :]
    xpad_buf[0:d_conv - 1, :] = xpad_buf[ts:ts + d_conv - 1, :]  # save halo for next chunk
    x_act = _silu(x_conv)                                       # (ts, d_inner) f32

    # ---- x_proj -> (dt | B | C), softplus(dt) ----
    ssm_p = jnp.dot(x_act.astype(matmul_dtype), w_xproj_ref[...],
                    preferred_element_type=jnp.float32)         # (ts, dt_rank + 2*d_state)
    dt = _softplus(ssm_p[:, 0:dt_rank])                         # (ts, 1)
    bm = ssm_p[:, dt_rank:dt_rank + d_state]                    # (ts, d_state)
    cm = ssm_p[:, dt_rank + d_state:dt_rank + 2 * d_state]      # (ts, d_state)

    # ---- vectorized per-step SSM coefficients (chunk-wide VPU/EUP work) ----
    a = a_ref[...]                                              # (d_inner, d_state)
    da_buf[...] = jnp.exp(dt[:, :, None] * a[None, :, :])       # delta_A
    bh_buf[...] = (dt[:, :, None] * bm[:, None, :]) * x_act[:, :, None]  # delta_B * x

    # ---- sequential selective scan over the chunk (state carried in VMEM) ----
    @pl.loop(0, ts)
    def _(t):
        h = da_buf[t] * h_state[...] + bh_buf[t]
        h_state[...] = h
        bh_buf[t] = h                        # reuse buffer: now holds h_t

    # y_t = <C_t, h_t> over d_state, done vectorized for the whole chunk
    y = jnp.sum(bh_buf[...] * cm[:, None, :], axis=-1)          # (ts, d_inner)
    y = y + x_in * d_ref[...]                                   # D-skip uses pre-conv x_in (as in spec)
    gated = y * _silu(z)

    # ---- out_proj (MXU) ----
    out = jnp.dot(gated.astype(matmul_dtype), w_out_ref[...],
                  preferred_element_type=jnp.float32)           # (ts, d_model)
    out_ref[0] = out.astype(out_ref.dtype)
    hlast_ref[0] = h_state[...].astype(hlast_ref.dtype)


# ----------------------------------------------------------------------------
# pallas_call wrapper
# ----------------------------------------------------------------------------
def _const_spec(shape):
    nd = len(shape)
    return pl.BlockSpec(shape, lambda b, c, _nd=nd: (0,) * _nd)


def mamba_block_forward(params, x, *, seq_tile=None, matmul_dtype=jnp.bfloat16):
    """Pallas forward of SimpleMambaBlock. Returns (output, h_last)."""
    B, S, d_model = x.shape
    d_state = params['A_log'].shape[-1]
    d_conv = params['conv_w'].shape[-1]
    d_inner = params['D'].shape[0]
    dt_rank = params['x_proj_w'].shape[0] - 2 * d_state
    # The PyTorch module's _ssm broadcast (dt_rank against d_inner) is only
    # shape-valid for dt_rank == 1 (i.e. d_model <= 16); mirror that here.
    assert dt_rank == 1, "SimpleMambaBlock._ssm requires dt_rank == 1"

    if seq_tile is None:
        seq_tile = S if S <= 128 else 128
    assert S % seq_tile == 0, "seq_len must be a multiple of seq_tile"
    assert seq_tile >= d_conv
    assert (seq_tile % 8 == 0) or (seq_tile == S)
    num_chunks = S // seq_tile

    # pack weights once: MXU operands in bf16 (f32 accumulate), VPU operands in f32
    w_in_t = params['in_proj_w'].T.astype(matmul_dtype)            # (d_model, 2*d_inner)
    w_xproj_t = params['x_proj_w'].T.astype(matmul_dtype)          # (d_inner, dt_rank+2*d_state)
    w_out_t = params['out_proj_w'].T.astype(matmul_dtype)          # (d_inner, d_model)
    conv_w = jnp.transpose(params['conv_w'][:, 0, :]).astype(jnp.float32)  # (d_conv, d_inner)
    conv_b = params['conv_b'][None, :].astype(jnp.float32)         # (1, d_inner)
    a_mat = (-jnp.exp(params['A_log'])).astype(jnp.float32)        # (d_inner, d_state)
    d_vec = params['D'][None, :].astype(jnp.float32)               # (1, d_inner)
    x = x.astype(jnp.float32)

    inputs = (x, w_in_t, conv_w, conv_b, w_xproj_t, a_mat, d_vec, w_out_t)
    in_specs = [pl.BlockSpec((1, seq_tile, d_model), lambda b, c: (b, c, 0))]
    in_specs += [_const_spec(a.shape) for a in inputs[1:]]          # weights stay resident

    out_shape = (jax.ShapeDtypeStruct((B, S, d_model), jnp.float32),
                 jax.ShapeDtypeStruct((B, d_inner, d_state), jnp.float32))
    out_specs = (pl.BlockSpec((1, seq_tile, d_model), lambda b, c: (b, c, 0)),
                 pl.BlockSpec((1, d_inner, d_state), lambda b, c: (b, 0, 0)))

    scratch_shapes = [
        pltpu.VMEM((seq_tile + d_conv - 1, d_inner), jnp.float32),   # conv halo + x_in
        pltpu.VMEM((d_inner, d_state), jnp.float32),                 # carried SSM state
        pltpu.VMEM((seq_tile, d_inner, d_state), jnp.float32),       # delta_A
        pltpu.VMEM((seq_tile, d_inner, d_state), jnp.float32),       # delta_B*x, then h_t
    ]

    # advisory cost estimate (whole call, all grid steps)
    mm_flops = 2 * B * S * (d_model * 2 * d_inner
                            + d_inner * (dt_rank + 2 * d_state)
                            + d_inner * d_model)
    other_flops = B * S * d_inner * (2 * d_conv + 6 * d_state + 8)
    cost = pl.CostEstimate(
        flops=mm_flops + other_flops,
        transcendentals=B * S * (d_inner * d_state + 2 * d_inner + dt_rank),
        bytes_accessed=int(x.size * 4 + B * S * d_model * 4
                           + B * d_inner * d_state * 4
                           + (w_in_t.size + w_xproj_t.size + w_out_t.size) * 2
                           + (conv_w.size + conv_b.size + a_mat.size + d_vec.size) * 4))

    kernel = functools.partial(mamba_block_kernel, d_conv=d_conv,
                               d_state=d_state, dt_rank=dt_rank,
                               matmul_dtype=matmul_dtype)
    return pl.pallas_call(
        kernel,
        grid=(B, num_chunks),
        in_specs=in_specs,
        out_specs=out_specs,
        out_shape=out_shape,
        scratch_shapes=scratch_shapes,
        compiler_params=pltpu.CompilerParams(
            dimension_semantics=("parallel", "arbitrary"),
            vmem_limit_bytes=32 * 1024 * 1024),
        cost_estimate=cost,
    )(*inputs)


# ----------------------------------------------------------------------------
# Parameters + pure-JAX f32 reference (mirrors the PyTorch module op-for-op)
# ----------------------------------------------------------------------------
def init_params(key, d_model, d_state=16, d_conv=4, expand=2):
    d_inner = int(expand * d_model)
    dt_rank = math.ceil(d_model / 16)
    ks = jax.random.split(key, 5)

    def uniform_init(k, shape, fan_in):
        bound = 1.0 / math.sqrt(fan_in)
        return jax.random.uniform(k, shape, jnp.float32, -bound, bound)

    return {
        'in_proj_w': uniform_init(ks[0], (2 * d_inner, d_model), d_model),
        'conv_w': uniform_init(ks[1], (d_inner, 1, d_conv), d_conv),
        'conv_b': uniform_init(ks[2], (d_inner,), d_conv),
        'x_proj_w': uniform_init(ks[3], (dt_rank + 2 * d_state, d_inner), d_inner),
        'out_proj_w': uniform_init(ks[4], (d_model, d_inner), d_inner),
        'A_log': jnp.log(jnp.tile(
            jnp.arange(1, d_state + 1, dtype=jnp.float32)[None, :], (d_inner, 1))),
        'D': jnp.ones((d_inner,), jnp.float32),
    }


def mamba_block_ref(params, x):
    B, S, d_model = x.shape
    d_state = params['A_log'].shape[-1]
    d_conv = params['conv_w'].shape[-1]
    d_inner = params['D'].shape[0]
    dt_rank = params['x_proj_w'].shape[0] - 2 * d_state

    xz = x @ params['in_proj_w'].T
    x_in, z = xz[..., :d_inner], xz[..., d_inner:]

    xp = jnp.pad(x_in, ((0, 0), (d_conv - 1, 0), (0, 0)))
    x_conv = jnp.zeros_like(x_in) + params['conv_b'][None, None, :]
    for k in range(d_conv):
        x_conv = x_conv + xp[:, k:k + S, :] * params['conv_w'][:, 0, k][None, None, :]
    x_act = _silu(x_conv)

    ssm_p = x_act @ params['x_proj_w'].T
    dt = _softplus(ssm_p[..., 0:dt_rank])
    Bm = ssm_p[..., dt_rank:dt_rank + d_state]
    Cm = ssm_p[..., dt_rank + d_state:dt_rank + 2 * d_state]
    A = -jnp.exp(params['A_log'])

    dA = jnp.exp(dt[..., None] * A[None, None])           # (B,S,d_inner,d_state)
    dB = dt[..., None] * Bm[:, :, None, :]                 # (B,S,1,d_state)
    h = jnp.zeros((B, d_inner, d_state), jnp.float32)
    ys = []
    for i in range(S):
        h = dA[:, i] * h + dB[:, i] * x_act[:, i][..., None]
        ys.append(jnp.sum(Cm[:, i][:, None, :] * h, axis=-1))
    y = jnp.stack(ys, axis=1)
    y = y + x_in * params['D'][None, None, :]
    out = (y * _silu(z)) @ params['out_proj_w'].T
    return out, h


# ----------------------------------------------------------------------------
if __name__ == "__main__":
    D_MODEL = 16       # dt_rank = ceil(16/16) = 1, required by the module's _ssm broadcast
    D_STATE = 16
    D_CONV = 4
    EXPAND = 2
    BATCH, SEQ = 2, 16
    SEQ_TILE = 8       # 2 chunks -> exercises the carried conv halo + SSM state

    key = jax.random.PRNGKey(0)
    pkey, xkey = jax.random.split(key)
    params = init_params(pkey, D_MODEL, D_STATE, D_CONV, EXPAND)
    x = jax.random.normal(xkey, (BATCH, SEQ, D_MODEL), jnp.float32)

    out, h_last = mamba_block_forward(params, x, seq_tile=SEQ_TILE)
    out = jax.block_until_ready(out)
    h_last = jax.block_until_ready(h_last)

    d_inner = int(EXPAND * D_MODEL)
    assert out.shape == (BATCH, SEQ, D_MODEL)
    assert h_last.shape == (BATCH, d_inner, D_STATE)

    out_ref, h_ref = mamba_block_ref(params, x)
    out_ref = jax.block_until_ready(out_ref)
    # kernel uses bf16 MXU inputs (f32 accumulation) vs the f32 reference
    assert jnp.allclose(out, out_ref, atol=5e-2, rtol=5e-2), (
        float(jnp.max(jnp.abs(out - out_ref))))
    assert jnp.allclose(h_last, h_ref, atol=5e-2, rtol=5e-2), (
        float(jnp.max(jnp.abs(h_last - h_ref))))

    # TODO(synk): the optional h_prev initial-state argument is not supported
    # (the PyTorch module itself raises NotImplementedError when it is passed).
    print("KERNEL_OK")
</pallas_src>

<mosaic_0001>
module attributes {stable_mosaic.version = 11 : i64} {
  func.func @mamba_block_kernel(%arg0: i32, %arg1: i32, %arg2: memref<1x8x16xf32, #tpu.memory_space<vmem>>, %arg3: memref<16x64xbf16, #tpu.memory_space<vmem>>, %arg4: memref<4x32xf32, #tpu.memory_space<vmem>>, %arg5: memref<1x32xf32, #tpu.memory_space<vmem>>, %arg6: memref<32x33xbf16, #tpu.memory_space<vmem>>, %arg7: memref<32x16xf32, #tpu.memory_space<vmem>>, %arg8: memref<1x32xf32, #tpu.memory_space<vmem>>, %arg9: memref<32x16xbf16, #tpu.memory_space<vmem>>, %arg10: memref<1x8x16xf32, #tpu.memory_space<vmem>>, %arg11: memref<1x32x16xf32, #tpu.memory_space<vmem>>, %arg12: memref<11x32xf32, #tpu.memory_space<vmem>>, %arg13: memref<32x16xf32, #tpu.memory_space<vmem>>, %arg14: memref<8x32x16xf32, #tpu.memory_space<vmem>>, %arg15: memref<8x32x16xf32, #tpu.memory_space<vmem>>) attributes {dimension_semantics = [#tpu.dimension_semantics<parallel>, #tpu.dimension_semantics<arbitrary>], iteration_bounds = array<i64: 2, 2>, scalar_prefetch = 0 : i64, scratch_operands = 4 : i64, tpu.core_type = #tpu.core_type<tc>, window_params = [{transform_indices = @transform_0, window_bounds = array<i64: 1, 8, 16>}, {pipeline_mode = #tpu.pipeline_mode<synchronous>, transform_indices = @transform_1, window_bounds = array<i64: 16, 64>}, {pipeline_mode = #tpu.pipeline_mode<synchronous>, transform_indices = @transform_2, window_bounds = array<i64: 4, 32>}, {pipeline_mode = #tpu.pipeline_mode<synchronous>, transform_indices = @transform_3, window_bounds = array<i64: 1, 32>}, {pipeline_mode = #tpu.pipeline_mode<synchronous>, transform_indices = @transform_4, window_bounds = array<i64: 32, 33>}, {pipeline_mode = #tpu.pipeline_mode<synchronous>, transform_indices = @transform_5, window_bounds = array<i64: 32, 16>}, {pipeline_mode = #tpu.pipeline_mode<synchronous>, transform_indices = @transform_6, window_bounds = array<i64: 1, 32>}, {pipeline_mode = #tpu.pipeline_mode<synchronous>, transform_indices = @transform_7, window_bounds = array<i64: 32, 16>}, {transform_indices = @transform_8, window_bounds = array<i64: 1, 8, 16>}, {transform_indices = @transform_9, window_bounds = array<i64: 1, 32, 16>}]} {
    %c0_i32 = arith.constant 0 : i32
    %0 = arith.cmpi eq, %arg1, %c0_i32 : i32
    %1 = arith.extui %0 : i1 to i32
    %c0_i32_0 = arith.constant 0 : i32
    %2 = arith.cmpi ne, %1, %c0_i32_0 : i32
    scf.if %2 {
      %cst_64 = arith.constant 0.000000e+00 : f32
      %106 = vector.broadcast %cst_64 : f32 to vector<32x16xf32>
      %c0_65 = arith.constant 0 : index
      %c0_66 = arith.constant 0 : index
      %107 = vector.load %arg13[%c0_65, %c0_66] : memref<32x16xf32, #tpu.memory_space<vmem>>, vector<32x16xf32>
      tpu.vector_store %arg13[%c0_65, %c0_66], %106 {strides = array<i32>} : memref<32x16xf32, #tpu.memory_space<vmem>>, vector<32x16xf32>,
      %cst_67 = arith.constant 0.000000e+00 : f32
      %108 = vector.broadcast %cst_67 : f32 to vector<3x32xf32>
      %c0_68 = arith.constant 0 : index
      %c0_69 = arith.constant 0 : index
      %109 = vector.load %arg12[%c0_68, %c0_69] : memref<11x32xf32, #tpu.memory_space<vmem>>, vector<3x32xf32>
      tpu.vector_store %arg12[%c0_68, %c0_69], %108 {strides = array<i32>} : memref<11x32xf32, #tpu.memory_space<vmem>>, vector<3x32xf32>,
    } else {
    }
    %c0 = arith.constant 0 : index
    %c0_1 = arith.constant 0 : index
    %c0_2 = arith.constant 0 : index
    %3 = vector.load %arg2[%c0, %c0_1, %c0_2] : memref<1x8x16xf32, #tpu.memory_space<vmem>>, vector<1x8x16xf32>
    %4 = vector.shape_cast %3 : vector<1x8x16xf32> to vector<8x16xf32>
    %5 = arith.truncf %4 : vector<8x16xf32> to vector<8x16xbf16>
    %c0_3 = arith.constant 0 : index
    %c0_4 = arith.constant 0 : index
    %6 = vector.load %arg3[%c0_3, %c0_4] : memref<16x64xbf16, #tpu.memory_space<vmem>>, vector<16x64xbf16>
    %cst = arith.constant dense<0.000000e+00> : vector<8x64xf32>
    %7 = tpu.matmul %5, %6, %cst {dimension_numbers = #tpu.dot_dimension_numbers<[1], [0], [0], [1], [0, 0, 1, 1], [], []>} : vector<8x16xbf16>, vector<16x64xbf16>, vector<8x64xf32> -> vector<8x64xf32>
    %8 = vector.extract_strided_slice %7 {offsets = [0, 0], sizes = [8, 32], strides = [1, 1]} : vector<8x64xf32> to vector<8x32xf32>
    %9 = vector.extract_strided_slice %7 {offsets = [0, 32], sizes = [8, 32], strides = [1, 1]} : vector<8x64xf32> to vector<8x32xf32>
    %c3 = arith.constant 3 : index
    %c0_5 = arith.constant 0 : index
    %10 = vector.load %arg12[%c3, %c0_5] : memref<11x32xf32, #tpu.memory_space<vmem>>, vector<8x32xf32>
    tpu.vector_store %arg12[%c3, %c0_5], %8 {strides = array<i32>} : memref<11x32xf32, #tpu.memory_space<vmem>>, vector<8x32xf32>,
    %c0_6 = arith.constant 0 : index
    %c0_7 = arith.constant 0 : index
    %11 = vector.load %arg5[%c0_6, %c0_7] : memref<1x32xf32, #tpu.memory_space<vmem>>, vector<1x32xf32>
    %12 = vector.shape_cast %11 : vector<1x32xf32> to vector<1x32xf32>
    %13 = vector.broadcast %12 : vector<1x32xf32> to vector<8x32xf32>
    %c0_8 = arith.constant 0 : index
    %c0_9 = arith.constant 0 : index
    %14 = vector.load %arg12[%c0_8, %c0_9] : memref<11x32xf32, #tpu.memory_space<vmem>>, vector<8x32xf32>
    %c0_10 = arith.constant 0 : index
    %c0_11 = arith.constant 0 : index
    %15 = vector.load %arg4[%c0_10, %c0_11] : memref<4x32xf32, #tpu.memory_space<vmem>>, vector<1x32xf32>
    %16 = vector.broadcast %15 : vector<1x32xf32> to vector<8x32xf32>
    %17 = arith.mulf %14, %16 : vector<8x32xf32>
    %18 = arith.addf %13, %17 : vector<8x32xf32>
    %c1 = arith.constant 1 : index
    %c0_12 = arith.constant 0 : index
    %19 = vector.load %arg12[%c1, %c0_12] : memref<11x32xf32, #tpu.memory_space<vmem>>, vector<8x32xf32>
    %c1_13 = arith.constant 1 : index
    %c0_14 = arith.constant 0 : index
    %20 = vector.load %arg4[%c1_13, %c0_14] : memref<4x32xf32, #tpu.memory_space<vmem>>, vector<1x32xf32>
    %21 = vector.broadcast %20 : vector<1x32xf32> to vector<8x32xf32>
    %22 = arith.mulf %19, %21 : vector<8x32xf32>
    %23 = arith.addf %18, %22 : vector<8x32xf32>
    %c2 = arith.constant 2 : index
    %c0_15 = arith.constant 0 : index
    %24 = vector.load %arg12[%c2, %c0_15] : memref<11x32xf32, #tpu.memory_space<vmem>>, vector<8x32xf32>
    %c2_16 = arith.constant 2 : index
    %c0_17 = arith.constant 0 : index
    %25 = vector.load %arg4[%c2_16, %c0_17] : memref<4x32xf32, #tpu.memory_space<vmem>>, vector<1x32xf32>
    %26 = vector.broadcast %25 : vector<1x32xf32> to vector<8x32xf32>
    %27 = arith.mulf %24, %26 : vector<8x32xf32>
    %28 = arith.addf %23, %27 : vector<8x32xf32>
    %c3_18 = arith.constant 3 : index
    %c0_19 = arith.constant 0 : index
    %29 = vector.load %arg12[%c3_18, %c0_19] : memref<11x32xf32, #tpu.memory_space<vmem>>, vector<8x32xf32>
    %c3_20 = arith.constant 3 : index
    %c0_21 = arith.constant 0 : index
    %30 = vector.load %arg4[%c3_20, %c0_21] : memref<4x32xf32, #tpu.memory_space<vmem>>, vector<1x32xf32>
    %31 = vector.broadcast %30 : vector<1x32xf32> to vector<8x32xf32>
    %32 = arith.mulf %29, %31 : vector<8x32xf32>
    %33 = arith.addf %28, %32 : vector<8x32xf32>
    %c8 = arith.constant 8 : index
    %c0_22 = arith.constant 0 : index
    %34 = vector.load %arg12[%c8, %c0_22] : memref<11x32xf32, #tpu.memory_space<vmem>>, vector<3x32xf32>
    %c0_23 = arith.constant 0 : index
    %c0_24 = arith.constant 0 : index
    %35 = vector.load %arg12[%c0_23, %c0_24] : memref<11x32xf32, #tpu.memory_space<vmem>>, vector<3x32xf32>
    tpu.vector_store %arg12[%c0_23, %c0_24], %34 {strides = array<i32>} : memref<11x32xf32, #tpu.memory_space<vmem>>, vector<3x32xf32>,
    %cst_25 = arith.constant 0.000000e+00 : f32
    %36 = vector.broadcast %cst_25 : f32 to vector<8x32xf32>
    %37 = arith.subf %36, %33 : vector<8x32xf32>
    %38 = math.exp %37 : vector<8x32xf32>
    %cst_26 = arith.constant 1.000000e+00 : f32
    %39 = vector.broadcast %cst_26 : f32 to vector<8x32xf32>
    %40 = arith.addf %39, %38 : vector<8x32xf32>
    %cst_27 = arith.constant 1.000000e+00 : f32
    %41 = vector.broadcast %cst_27 : f32 to vector<8x32xf32>
    %42 = arith.divf %41, %40 : vector<8x32xf32>
    %43 = arith.mulf %33, %42 : vector<8x32xf32>
    %44 = arith.truncf %43 : vector<8x32xf32> to vector<8x32xbf16>
    %c0_28 = arith.constant 0 : index
    %c0_29 = arith.constant 0 : index
    %45 = vector.load %arg6[%c0_28, %c0_29] : memref<32x33xbf16, #tpu.memory_space<vmem>>, vector<32x33xbf16>
    %cst_30 = arith.constant dense<0.000000e+00> : vector<8x33xf32>
    %46 = tpu.matmul %44, %45, %cst_30 {dimension_numbers = #tpu.dot_dimension_numbers<[1], [0], [0], [1], [0, 0, 1, 1], [], []>} : vector<8x32xbf16>, vector<32x33xbf16>, vector<8x33xf32> -> vector<8x33xf32>
    %47 = vector.extract_strided_slice %46 {offsets = [0, 0], sizes = [8, 1], strides = [1, 1]} : vector<8x33xf32> to vector<8x1xf32>
    %cst_31 = arith.constant 0.000000e+00 : f32
    %48 = vector.broadcast %cst_31 : f32 to vector<8x1xf32>
    %49 = arith.maximumf %47, %48 : vector<8x1xf32>
    %50 = math.absf %47 : vector<8x1xf32>
    %cst_32 = arith.constant 0.000000e+00 : f32
    %51 = vector.broadcast %cst_32 : f32 to vector<8x1xf32>
    %52 = arith.subf %51, %50 : vector<8x1xf32>
    %53 = math.exp %52 : vector<8x1xf32>
    %cst_33 = arith.constant 1.000000e+00 : f32
    %54 = vector.broadcast %cst_33 : f32 to vector<8x1xf32>
    %55 = arith.addf %54, %53 : vector<8x1xf32>
    %56 = math.log %55 : vector<8x1xf32>
    %57 = arith.addf %49, %56 : vector<8x1xf32>
    %58 = vector.extract_strided_slice %46 {offsets = [0, 1], sizes = [8, 16], strides = [1, 1]} : vector<8x33xf32> to vector<8x16xf32>
    %59 = vector.extract_strided_slice %46 {offsets = [0, 17], sizes = [8, 16], strides = [1, 1]} : vector<8x33xf32> to vector<8x16xf32>
    %c0_34 = arith.constant 0 : index
    %c0_35 = arith.constant 0 : index
    %60 = vector.load %arg7[%c0_34, %c0_35] : memref<32x16xf32, #tpu.memory_space<vmem>>, vector<32x16xf32>
    %61 = vector.shape_cast %57 : vector<8x1xf32> to vector<8x1x1xf32>
    %62 = vector.shape_cast %60 : vector<32x16xf32> to vector<1x32x16xf32>
    %63 = vector.broadcast %61 : vector<8x1x1xf32> to vector<8x32x16xf32>
    %64 = vector.broadcast %62 : vector<1x32x16xf32> to vector<8x32x16xf32>
    %65 = arith.mulf %63, %64 : vector<8x32x16xf32>
    %66 = math.exp %65 : vector<8x32x16xf32>
    %c0_36 = arith.constant 0 : index
    %c0_37 = arith.constant 0 : index
    %c0_38 = arith.constant 0 : index
    %67 = vector.load %arg14[%c0_36, %c0_37, %c0_38] : memref<8x32x16xf32, #tpu.memory_space<vmem>>, vector<8x32x16xf32>
    tpu.vector_store %arg14[%c0_36, %c0_37, %c0_38], %66 {strides = array<i32>} : memref<8x32x16xf32, #tpu.memory_space<vmem>>, vector<8x32x16xf32>,
    %68 = vector.shape_cast %57 : vector<8x1xf32> to vector<8x1x1xf32>
    %69 = vector.shape_cast %58 : vector<8x16xf32> to vector<8x1x16xf32>
    %70 = vector.broadcast %68 : vector<8x1x1xf32> to vector<8x1x16xf32>
    %71 = arith.mulf %70, %69 : vector<8x1x16xf32>
    %72 = vector.shape_cast %43 : vector<8x32xf32> to vector<8x32x1xf32>
    %73 = vector.broadcast %71 : vector<8x1x16xf32> to vector<8x32x16xf32>
    %74 = vector.broadcast %72 : vector<8x32x1xf32> to vector<8x32x16xf32>
    %75 = arith.mulf %73, %74 : vector<8x32x16xf32>
    %c0_39 = arith.constant 0 : index
    %c0_40 = arith.constant 0 : index
    %c0_41 = arith.constant 0 : index
    %76 = vector.load %arg15[%c0_39, %c0_40, %c0_41] : memref<8x32x16xf32, #tpu.memory_space<vmem>>, vector<8x32x16xf32>
    tpu.vector_store %arg15[%c0_39, %c0_40, %c0_41], %75 {strides = array<i32>} : memref<8x32x16xf32, #tpu.memory_space<vmem>>, vector<8x32x16xf32>,
    %c0_i32_42 = arith.constant 0 : i32
    %c8_i32 = arith.constant 8 : i32
    %77 = arith.addi %c0_i32_42, %c8_i32 : i32
    %c1_i32 = arith.constant 1 : i32
    scf.for %arg16 = %c0_i32_42 to %77 step %c1_i32  : i32 {
      %c1_i32_64 = arith.constant 1 : i32
      %106 = arith.muli %arg16, %c1_i32_64 : i32
      %c0_i32_65 = arith.constant 0 : i32
      %107 = arith.addi %c0_i32_65, %106 : i32
      %108 = arith.index_cast %107 : i32 to index
      %c0_66 = arith.constant 0 : index
      %c0_67 = arith.constant 0 : index
      %109 = vector.load %arg14[%108, %c0_66, %c0_67] : memref<8x32x16xf32, #tpu.memory_space<vmem>>, vector<1x32x16xf32>
      %110 = vector.shape_cast %109 : vector<1x32x16xf32> to vector<32x16xf32>
      %c0_68 = arith.constant 0 : index
      %c0_69 = arith.constant 0 : index
      %111 = vector.load %arg13[%c0_68, %c0_69] : memref<32x16xf32, #tpu.memory_space<vmem>>, vector<32x16xf32>
      %112 = arith.mulf %110, %111 : vector<32x16xf32>
      %113 = arith.index_cast %107 : i32 to index
      %c0_70 = arith.constant 0 : index
      %c0_71 = arith.constant 0 : index
      %114 = vector.load %arg15[%113, %c0_70, %c0_71] : memref<8x32x16xf32, #tpu.memory_space<vmem>>, vector<1x32x16xf32>
      %115 = vector.shape_cast %114 : vector<1x32x16xf32> to vector<32x16xf32>
      %116 = arith.addf %112, %115 : vector<32x16xf32>
      %c0_72 = arith.constant 0 : index
      %c0_73 = arith.constant 0 : index
      %117 = vector.load %arg13[%c0_72, %c0_73] : memref<32x16xf32, #tpu.memory_space<vmem>>, vector<32x16xf32>
      tpu.vector_store %arg13[%c0_72, %c0_73], %116 {strides = array<i32>} : memref<32x16xf32, #tpu.memory_space<vmem>>, vector<32x16xf32>,
      %118 = arith.index_cast %107 : i32 to index
      %c0_74 = arith.constant 0 : index
      %c0_75 = arith.constant 0 : index
      %119 = vector.load %arg15[%118, %c0_74, %c0_75] : memref<8x32x16xf32, #tpu.memory_space<vmem>>, vector<1x32x16xf32>
      %120 = vector.shape_cast %119 : vector<1x32x16xf32> to vector<32x16xf32>
      %121 = vector.shape_cast %116 : vector<32x16xf32> to vector<1x32x16xf32>
      tpu.vector_store %arg15[%118, %c0_74, %c0_75], %121 {strides = array<i32>} : memref<8x32x16xf32, #tpu.memory_space<vmem>>, vector<1x32x16xf32>,
    }
    %c8_i32_43 = arith.constant 8 : i32
    %c0_44 = arith.constant 0 : index
    %c0_45 = arith.constant 0 : index
    %c0_46 = arith.constant 0 : index
    %78 = vector.load %arg15[%c0_44, %c0_45, %c0_46] : memref<8x32x16xf32, #tpu.memory_space<vmem>>, vector<8x32x16xf32>
    %79 = vector.shape_cast %59 : vector<8x16xf32> to vector<8x1x16xf32>
    %80 = vector.broadcast %79 : vector<8x1x16xf32> to vector<8x32x16xf32>
    %81 = arith.mulf %78, %80 : vector<8x32x16xf32>
    %cst_47 = arith.constant dense<0.000000e+00> : vector<8x32xf32>
    %82 = vector.multi_reduction <add>, %81, %cst_47 [2] : vector<8x32x16xf32> to vector<8x32xf32>
    %c0_48 = arith.constant 0 : index
    %c0_49 = arith.constant 0 : index
    %83 = vector.load %arg8[%c0_48, %c0_49] : memref<1x32xf32, #tpu.memory_space<vmem>>, vector<1x32xf32>
    %84 = vector.broadcast %83 : vector<1x32xf32> to vector<8x32xf32>
    %85 = arith.mulf %8, %84 : vector<8x32xf32>
    %86 = arith.addf %82, %85 : vector<8x32xf32>
    %cst_50 = arith.constant 0.000000e+00 : f32
    %87 = vector.broadcast %cst_50 : f32 to vector<8x32xf32>
    %88 = arith.subf %87, %9 : vector<8x32xf32>
    %89 = math.exp %88 : vector<8x32xf32>
    %cst_51 = arith.constant 1.000000e+00 : f32
    %90 = vector.broadcast %cst_51 : f32 to vector<8x32xf32>
    %91 = arith.addf %90, %89 : vector<8x32xf32>
    %cst_52 = arith.constant 1.000000e+00 : f32
    %92 = vector.broadcast %cst_52 : f32 to vector<8x32xf32>
    %93 = arith.divf %92, %91 : vector<8x32xf32>
    %94 = arith.mulf %9, %93 : vector<8x32xf32>
    %95 = arith.mulf %86, %94 : vector<8x32xf32>
    %96 = arith.truncf %95 : vector<8x32xf32> to vector<8x32xbf16>
    %c0_53 = arith.constant 0 : index
    %c0_54 = arith.constant 0 : index
    %97 = vector.load %arg9[%c0_53, %c0_54] : memref<32x16xbf16, #tpu.memory_space<vmem>>, vector<32x16xbf16>
    %cst_55 = arith.constant dense<0.000000e+00> : vector<8x16xf32>
    %98 = tpu.matmul %96, %97, %cst_55 {dimension_numbers = #tpu.dot_dimension_numbers<[1], [0], [0], [1], [0, 0, 1, 1], [], []>} : vector<8x32xbf16>, vector<32x16xbf16>, vector<8x16xf32> -> vector<8x16xf32>
    %c0_56 = arith.constant 0 : index
    %c0_57 = arith.constant 0 : index
    %c0_58 = arith.constant 0 : index
    %99 = vector.load %arg10[%c0_56, %c0_57, %c0_58] : memref<1x8x16xf32, #tpu.memory_space<vmem>>, vector<1x8x16xf32>
    %100 = vector.shape_cast %99 : vector<1x8x16xf32> to vector<8x16xf32>
    %101 = vector.shape_cast %98 : vector<8x16xf32> to vector<1x8x16xf32>
    tpu.vector_store %arg10[%c0_56, %c0_57, %c0_58], %101 {strides = array<i32>} : memref<1x8x16xf32, #tpu.memory_space<vmem>>, vector<1x8x16xf32>,
    %c0_59 = arith.constant 0 : index
    %c0_60 = arith.constant 0 : index
    %102 = vector.load %arg13[%c0_59, %c0_60] : memref<32x16xf32, #tpu.memory_space<vmem>>, vector<32x16xf32>
    %c0_61 = arith.constant 0 : index
    %c0_62 = arith.constant 0 : index
    %c0_63 = arith.constant 0 : index
    %103 = vector.load %arg11[%c0_61, %c0_62, %c0_63] : memref<1x32x16xf32, #tpu.memory_space<vmem>>, vector<1x32x16xf32>
    %104 = vector.shape_cast %103 : vector<1x32x16xf32> to vector<32x16xf32>
    %105 = vector.shape_cast %102 : vector<32x16xf32> to vector<1x32x16xf32>
    tpu.vector_store %arg11[%c0_61, %c0_62, %c0_63], %105 {strides = array<i32>} : memref<1x32x16xf32, #tpu.memory_space<vmem>>, vector<1x32x16xf32>,
    return
  }
  func.func @transform_0(%arg0: i32, %arg1: i32) -> (i32, i32, i32) {
    %c0_i32 = arith.constant 0 : i32
    %c0_i32_0 = arith.constant 0 : i32
    return %arg0, %arg1, %c0_i32 : i32, i32, i32
  }
  func.func @transform_1(%arg0: i32, %arg1: i32) -> (i32, i32) {
    %c0_i32 = arith.constant 0 : i32
    %c0_i32_0 = arith.constant 0 : i32
    %c0_i32_1 = arith.constant 0 : i32
    return %c0_i32, %c0_i32_0 : i32, i32
  }
  func.func @transform_2(%arg0: i32, %arg1: i32) -> (i32, i32) {
    %c0_i32 = arith.constant 0 : i32
    %c0_i32_0 = arith.constant 0 : i32
    %c0_i32_1 = arith.constant 0 : i32
    return %c0_i32, %c0_i32_0 : i32, i32
  }
  func.func @transform_3(%arg0: i32, %arg1: i32) -> (i32, i32) {
    %c0_i32 = arith.constant 0 : i32
    %c0_i32_0 = arith.constant 0 : i32
    %c0_i32_1 = arith.constant 0 : i32
    return %c0_i32, %c0_i32_0 : i32, i32
  }
  func.func @transform_4(%arg0: i32, %arg1: i32) -> (i32, i32) {
    %c0_i32 = arith.constant 0 : i32
    %c0_i32_0 = arith.constant 0 : i32
    %c0_i32_1 = arith.constant 0 : i32
    return %c0_i32, %c0_i32_0 : i32, i32
  }
  func.func @transform_5(%arg0: i32, %arg1: i32) -> (i32, i32) {
    %c0_i32 = arith.constant 0 : i32
    %c0_i32_0 = arith.constant 0 : i32
    %c0_i32_1 = arith.constant 0 : i32
    return %c0_i32, %c0_i32_0 : i32, i32
  }
  func.func @transform_6(%arg0: i32, %arg1: i32) -> (i32, i32) {
    %c0_i32 = arith.constant 0 : i32
    %c0_i32_0 = arith.constant 0 : i32
    %c0_i32_1 = arith.constant 0 : i32
    return %c0_i32, %c0_i32_0 : i32, i32
  }
  func.func @transform_7(%arg0: i32, %arg1: i32) -> (i32, i32) {
    %c0_i32 = arith.constant 0 : i32
    %c0_i32_0 = arith.constant 0 : i32
    %c0_i32_1 = arith.constant 0 : i32
    return %c0_i32, %c0_i32_0 : i32, i32
  }
  func.func @transform_8(%arg0: i32, %arg1: i32) -> (i32, i32, i32) {
    %c0_i32 = arith.constant 0 : i32
    %c0_i32_0 = arith.constant 0 : i32
    return %arg0, %arg1, %c0_i32 : i32, i32, i32
  }
  func.func @transform_9(%arg0: i32, %arg1: i32) -> (i32, i32, i32) {
    %c0_i32 = arith.constant 0 : i32
    %c0_i32_0 = arith.constant 0 : i32
    %c0_i32_1 = arith.constant 0 : i32
    return %arg0, %c0_i32, %c0_i32_0 : i32, i32, i32
  }
}

</mosaic_0001>

<bundles_post_ra>
// kernel: tpu_custom_call.1
= control target key start
LH: loop header
LB: loop body
LE: loop exit
PB: predicated region body
PF: predicated region fallthrough
CT: control target
= control target key end

     0   :  { %s3932_s0 = inlined_call_operand.vmem [shape: f32[2,16,16], index: 0, kind: input, shape index: {}]   ;;  %s3933_s1 = inlined_call_operand.vmem [shape: bf16[16,64], index: 1, kind: input, shape index: {}]   ;;  %s3934_s2 = inlined_call_operand.vmem [shape: f32[4,32], index: 2, kind: input, shape index: {}]   ;;  %s3935_s3 = inlined_call_operand.hbm [shape: f32[1,32], index: 3, kind: input, shape index: {}]   ;;  %s3936_s4 = inlined_call_operand.vmem [shape: bf16[32,33], index: 4, kind: input, shape index: {}]   ;;  %s3937_s5 = inlined_call_operand.vmem [shape: f32[32,16], index: 5, kind: input, shape index: {}]   ;;  %s3938_s6 = inlined_call_operand.vmem [shape: f32[1,32], index: 6, kind: input, shape index: {}]   ;;  %s3939_s7 = inlined_call_operand.vmem [shape: bf16[32,16], index: 7, kind: input, shape index: {}]   ;;  %s3940_s8 = inlined_call_operand.hbm [shape: f32[2,16,16], index: 8, kind: output, shape index: {0}]   ;;  %s3941_s9 = inlined_call_operand.vmem [shape: f32[2,32,16], index: 9, kind: output, shape index: {1}]  }
   0x1   :  { %3950 = sst [smem:[#allocation34_spill]] %s3935_s3 }
   0x2   :  { %15 = vsyncpa [#allocation7], 0 }
   0x3   :  { %16 = vsyncpa [#allocation8], 0 }
   0x4   :  { %18 = vsyncpa [#allocation8 + $0x1], 0  ;;  %s2902_s30 = smov 0   ;;  %s2904_s10 = smov 0  }
   0x5   :  { %s2906_s11 = smov 0   ;;  %s2908_s12 = smov 0  }
   0x6   :  { %s2910_s13 = smov 0   ;;  %s2912_s14 = smov 0  }
   0x7   :  { %s2914_s15 = smov 0   ;;  %s2916_s16 = smov 0  }
   0x8 LB: > { %3951 = sst [smem:[#allocation12_spill]] %s2821_s11  ;;  %s2387_s17 = sadd.s32 4294967295, %s2841_s16   ;;  %s2841_s16 = sphi %s2916_s16, %s24_s16   ;;  %s2837_s15 = sphi %s2914_s15, %s3999_s15   ;;  %s2833_s14 = sphi %s2912_s14, %s3998_s14   ;;  %s2829_s13 = sphi %s2910_s13, %s3997_s13   ;;  %s2825_s12 = sphi %s2908_s12, %s3996_s12   ;;  %s2821_s11 = sphi %s2906_s11, %s3995_s11   ;;  %s2817_s10 = sphi %s2904_s10, %s4001_s10   ;;  %s2813_s30 = sphi %s2902_s30, %s4000_s30  }
   0x9   : > { %3952 = sst [smem:[#allocation13_spill]] %s2833_s14  ;;  %s2388_s18 = sadd.s32 4294967294, %s2841_s16  }
   0xa   : > { %3953 = sst [smem:[#allocation14_spill]] %s2837_s15  ;;  %s33_s19 = sadd.s32 1, %s2833_s14 }
   0xb   : > { %s36_s20 = sadd.s32 1, %s2837_s15  ;;  %p34_p0 = scmp.ge.s32.totalorder %s33_s19, 2 }
   0xc   : > { %s220_s21 = sadd.s32 1, %s2821_s11  ;;  %p230_p1 = scmp.ne.s32.totalorder %s2821_s11, %s2817_s10 }
   0xd   : > { %p231_p2 = scmp.eq.s32.totalorder %s2387_s17, 3  ;;  %s4003_s19 = smov (%p34_p0, %s33_s19), 0 }
   0xe   : > { %3954 = sst [smem:[#allocation15_spill]] %s4003_s19  ;;  %s4005_s20 = smov (!%p34_p0, %s36_s20), %s2837_s15 }
   0xf   : > { %s216_s22 = ssub.s32 %s2833_s14, %s4003_s19  ;;  %p2954_p3 = por %p231_p2, %p230_p1 }
  0x10   : > { %p38_p4 = scmp.ge.s32.totalorder %s4005_s20, 2  ;;  %p236_p5 = scmp.ne.s32.totalorder %s2817_s10, %s2813_s30 }
  0x11   : > { %p237_p6 = scmp.eq.s32.totalorder %s2388_s18, 3  ;;  %p2389_p7 = scmp.ge.s32.totalorder %s2841_s16, 1 }
  0x12   : > { %s4007_s20 = smov (%p38_p4, %s4005_s20), 0  ;;  %p270_p9 = scmp.lt.s32.totalorder %s2841_s16, 5 }
  0x13   : > { %3956 = sst [smem:[#allocation16_spill]] %s4007_s20  ;;  %p2963_p8 = por %p237_p6, %p236_p5 }
  0x14   : > { %s215_s25 = ssub.s32 %s2837_s15, %s4007_s20  ;;  %p271_p10 = pnand %p2389_p7, %p270_p9 }
  0x15   : > { %s217_s26 = sor.u32 %s216_s22, %s215_s25  ;;  %p2449_p12 = scmp.eq.s32.totalorder %s2387_s17, 0 }
  0x16   : > { %p218_p11 = scmp.eq.s32.totalorder %s217_s26, 0  ;;  %p2441_p13 = pneg %p271_p10 }
  0x17   : > { %s3958_s3 = sld [smem:[#allocation34_spill]]  ;;  %s2847_s19 = smov [#allocation6]  }
  0x18   : > { %s2974_s18 = scalar_select %p218_p11, %s2821_s11, %s220_s21  }
  0x19   : > { %s290_s14 = sshll.u32 %s2847_s19, 4  ;;  %p2442_p0 = pnand %p2449_p12, %p2441_p13  ;;  %s291_s14 = int_to_ptr.vmem [resolvable:$true] %s290_s14 }
  0x1a   : > { %3959 = sst [smem:[#allocation17_spill]] %s2974_s18  ;;  %326 = sbr.rel (%p271_p10) target bundleno = 1736 (0x6c8), region = 52 }
  0x1d   : > { %s288_s29 = sshll.u32 %s3958_s3, 4  ;;  %s289_s29 = int_to_ptr.hbm [resolvable:$true] %s288_s29 }
  0x1e   : > { %2444 = dma.hbm_to_vmem [thread:$0]  (!%p2442_p0), %s289_s29, 16, %s291_s14, [#allocation7]  }
  0x1f   : > { %2804 = dma.done.wait (%p2449_p12), [#allocation7], 16  }
  0x20   : > { %2806 = vsyncadd (%p2449_p12), [#allocation7], 4294967280  ;;  %s361_s17 = sand.u32 1, %s2817_s10   ;;  %p371_p1 = scmp.lt.s32.totalorder %s2829_s13, 1 }
  0x21   : > { %s2980_s21 = sshll.u32 %s361_s17, 3  ;;  %p373_p2 = scmp.lt.s32.totalorder %s2825_s12, 1 }
  0x22   : > { %s372_s19 = scalar_select %p371_p1, %s2829_s13, 1 }
  0x23   : > { %s374_s22 = scalar_select %p373_p2, %s2825_s12, 1 }
  0x24   : > { %s2395_s25 = sshll.u32 %s372_s19, 1  ;;  %s2429_s14 = sshll.u32 %s372_s19, 5 }
  0x25   : > { %s376_s26 = sadd.s32 %s2395_s25, %s374_s22  ;;  %s2988_s29 = scalar_lea.vmem %s3941_s9, %s2429_s14 }
  0x26   : > { %s2396_s3 = sshll.u32 %s376_s26, 3  ;;  %s363_s11 = scalar_lea.vmem [#allocation9], %s2980_s21 }
  0x27   : > { %s378_s18 = scalar_lea.vmem %s3932_s0, %s2396_s3  ;;  %p2399_p4 = scmp.ne.s32.totalorder %s2825_s12, 0 }
  0x29   : > { %388 = sbr.rel (%p2399_p4) target bundleno = 52 (0x34), region = 60 }
  0x2e   : > { %vm389_vm0 = vcmask 130048   ;;  %v2848_v0 = vmov 0.0   ;;  %vm394_vm1 = vcmask 256000  }
  0x2f   : > { %390 = vst.msk [vmem:[#allocation3] sm:$0xff] %vm389_vm0, %v2848_v0 }
  0x30   : > { %391 = vst.msk [vmem:[#allocation3 + $0x8] sm:$0xff] %vm389_vm0, %v2848_v0 }
  0x31   : > { %392 = vst.msk [vmem:[#allocation3 + $0x10] sm:$0xff] %vm389_vm0, %v2848_v0 }
  0x32   : > { %393 = vst.msk [vmem:[#allocation3 + $0x18] sm:$0xff] %vm389_vm0, %v2848_v0 }
  0x33   : > { %395 = vst.msk [vmem:[#allocation2] sm:$0x7] %vm394_vm1, %v2848_v0 }
  0x34 PF: > { %v2430_v1 = vld [vmem:[%s3933_s1] sm:$0xff]  ;;  %vm406_vm2 = vcmask 130048   ;;  %vm423_vm3 = vcmask 261120   ;;  %v2565_v6 = vld [vmem:[#allocation6] ss:$0 sm:$0xff]  ;;  %vm450_vm4 = vcmask 256000   ;;  %v3947_v12 = vlaneseq }
  0x35   : > { %v396_v2 = vld [vmem:[%s378_s18] sm:$0xff]  ;;  %417 = vmatpush.bf16.msra.mxu0 %v2430_v1  ;;  %v2432_v25 = vld [vmem:[%s3936_s4 + $0x8] sm:$0xff]  ;;  %v3948_v54 = vmov 0   ;;  %s2850_s19 = smov 127   ;;  %s3364_s22 = smov 0  }
  0x36   : > { %v397_v3 = vpack.c.bf16 %v396_v2, %v396_v2  ;;  %v2566_v5 = vld [vmem:[%s3934_s2] ss:$0 sm:$0xff]  ;;  %v2567_v7 = vld [vmem:[%s3934_s2 + $0x1] ss:$0 sm:$0xff]  ;;  %v2568_v14 = vld [vmem:[%s3934_s2 + $0x2] ss:$0 sm:$0xff]  ;;  %498 = vmatpush.bf16.msra.mxu1 %v2432_v25 }
  0x37   : > { %v3013_v16 = vshrl.u32 %v3947_v12, 7  ;;  %v2569_v19 = vld [vmem:[%s3934_s2 + $0x3] ss:$0 sm:$0xff] }
  0x38   : > { %2404 = vmatmul.msk.bf16.vlgmr.msra.gmra.mxu0 %vm406_vm2, %v397_v3  ;;  %v2431_v29 = vld [vmem:[%s3936_s4] sm:$0xff] }
  0x39   : > { %2529 = vset.pattern.permute.xlu1 %v3013_v16  ;;  %v3020_v21 = vadd.s32 16, %v3013_v16  ;;  %v3023_v22 = vadd.s32 8, %v3013_v16  ;;  %v3040_v47 = vadd.s32 24, %v3013_v16 }
  0x3a   : > { %499 = vmatpush.bf16.msra.mxu1 %v2431_v29 }
  0x3b   : > { %2531 = vset.pattern.permute.xlu0 %v3020_v21  ;;  %2530 = vset.pattern.permute.xlu2 %v3023_v22 }
  0xb5   : > { %v2999_v4 = vpop.f32.mrf.mxu0 }
  0xb6   : > { %424 = vst.msk [vmem:[#allocation2 + $0x3] sm:$0xff] %vm423_vm3, %v2999_v4 }
  0xbd   : > { %v429_v8 = vld [vmem:[#allocation2] sm:$0xff]  ;;  %v421_v11 = vpop.f32.mrf.mxu0  ;;  %v449_v15 = vld [vmem:[#allocation2 + $0x8] sm:$0x7] }
  0xbe   : > { %v434_v9 = vld [vmem:[#allocation2 + $0x1] sm:$0xff]  ;;  %v432_v13 = vmul.f32 %v2566_v5, %v429_v8 }
  0xbf   : > { %v439_v10 = vld [vmem:[#allocation2 + $0x2] sm:$0xff]  ;;  %v437_v18 = vmul.f32 %v2567_v7, %v434_v9 }
  0xc0   : > { %451 = vst.msk [vmem:[#allocation2] sm:$0x7] %vm450_vm4, %v449_v15  ;;  %v433_v17 = vadd.f32 %v2565_v6, %v432_v13  ;;  %v444_v20 = vld [vmem:[#allocation2 + $0x3] sm:$0xff]  ;;  %v442_v24 = vmul.f32 %v2568_v14, %v439_v10 }
  0xc1   : > { %v447_v27 = vmul.f32 %v2569_v19, %v444_v20 }
  0xc2   : > { %v438_v23 = vadd.f32 %v437_v18, %v433_v17 }
  0xc4   : > { %v443_v26 = vadd.f32 %v442_v24, %v438_v23 }
  0xc6   : > { %v448_v28 = vadd.f32 %v447_v27, %v443_v26 }
  0xc8   : > { %v452_v30 = vsub.f32 0.0, %v448_v28 }
  0xca   : > { %v453_v31 = vmul.f32 1.442695, %v452_v30 }
  0xcc   : > { %2570 = vpow2.f32 %v453_v31 }
  0xd2   : > { %v2571_v32 = vpop.eup %2570 }
  0xd3   : > { %v455_v33 = vadd.f32 1.0, %v2571_v32 }
  0xd5   : > { %2572 = vrcp.f32 %v455_v33  ;;  %v467_v37 = vand.u32 2147483648, %v455_v33  ;;  %v465_v39 = vand.u32 2147483647, %v455_v33  ;;  %vm461_vm6 = vweird.f32 %v455_v33 }
  0xd7   : > { %v468_v41 = vor.u32 1.1754944e-38, %v467_v37  ;;  %vm466_vm8 = vcmp.eq.f32.partialorder %v465_v39, 8.507059e+37 }
  0xdb   : > { %v2573_v34 = vpop.eup %2572 }
  0xdc   : > { %v457_v35 = vmul.f32 %v2573_v34, %v455_v33  ;;  %vm462_vm5 = vweird.f32 %v2573_v34 }
  0xdd   : > { %vm463_vm7 = vmor %vm461_vm6, %vm462_vm5 }
  0xde   : > { %v458_v36 = vsub.f32 1.0, %v457_v35 }
  0xe0   : > { %v459_v38 = vmul.f32 %v2573_v34, %v458_v36 }
  0xe2   : > { %v460_v40 = vadd.f32 %v2573_v34, %v459_v38 }
  0xe4   : > { %v464_v42 = vsel %vm463_vm7, %v2573_v34, %v460_v40 }
  0xe5   : > { %v469_v43 = vsel %vm466_vm8, %v468_v41, %v464_v42 }
  0xe6   : > { %v3033_v44 = vmul.f32 %v469_v43, %v448_v28 }
  0xe8   : > { %v757_v45 = vperm.slane %v3033_v44, 0  ;;  %v472_v46 = vpack.c.bf16 %v3033_v44, %v3033_v44  ;;  %v782_v48 = vperm.slane %v3033_v44, 1  ;;  %v832_v49 = vperm.slane %v3033_v44, 3 }
  0xe9   : > { %v857_v50 = vperm.slane %v3033_v44, 4  ;;  %v807_v51 = vperm.slane %v3033_v44, 2  ;;  %v882_v52 = vperm.slane %v3033_v44, 5  ;;  %v907_v53 = vperm.slane %v3033_v44, 6 }
  0xea   : > { %774 = vperm.xlu0 %2531, %v757_v45   ;;  %768 = vperm.xlu2 %2530, %v757_v45   ;;  %v932_v6 = vperm.slane %v3033_v44, 7 }
  0xeb   : > { %762 = vperm.xlu1 %2529, %v757_v45   ;;  %2413 = vmatmul.msk.bf16.vlgmr.msra.gmra.mxu1 %vm423_vm3, %v472_v46 }
  0xf2   : > { %2536 = vset.pattern.permute.xlu0 %v3040_v47  ;;  %2533 = vset.pattern.permute.xlu2 %v3013_v16 }
  0xf3   : > { %2532 = vset.pattern.permute.xlu1 %v3040_v47 }
  0xfa   : > { %805 = vperm.xlu0 %2536, %v782_v48   ;;  %787 = vperm.xlu2 %2533, %v782_v48  }
  0xfb   : > { %780 = vperm.xlu1 %2532, %v757_v45  }
 0x102   : > { %2541 = vset.pattern.permute.xlu0 %v3013_v16  ;;  %2535 = vset.pattern.permute.xlu2 %v3020_v21 }
 0x103   : > { %2534 = vset.pattern.permute.xlu1 %v3023_v22 }
 0x10a   : > { %837 = vperm.xlu0 %2541, %v832_v49   ;;  %799 = vperm.xlu2 %2535, %v782_v48  }
 0x10b   : > { %793 = vperm.xlu1 %2534, %v782_v48   ;;  %v3137_v48 = vld [vmem:[%s3937_s5] sm:$0xff] }
 0x112   : > { %2546 = vset.pattern.permute.xlu0 %v3023_v22  ;;  %2538 = vset.pattern.permute.xlu2 %v3023_v22 }
 0x113   : > { %2537 = vset.pattern.permute.xlu1 %v3013_v16 }
 0x11a   : > { %868 = vperm.xlu0 %2546, %v857_v50   ;;  %818 = vperm.xlu2 %2538, %v807_v51  }
 0x11b   : > { %812 = vperm.xlu1 %2537, %v807_v51  }
 0x122   : > { %2551 = vset.pattern.permute.xlu0 %v3020_v21  ;;  %2540 = vset.pattern.permute.xlu2 %v3040_v47 }
 0x123   : > { %2539 = vset.pattern.permute.xlu1 %v3020_v21 }
 0x12a   : > { %899 = vperm.xlu0 %2551, %v882_v52   ;;  %830 = vperm.xlu2 %2540, %v807_v51  }
 0x12b   : > { %824 = vperm.xlu1 %2539, %v807_v51   ;;  %v3149_v51 = vld [vmem:[%s3937_s5 + $0x10] sm:$0xff] }
 0x132   : > { %2556 = vset.pattern.permute.xlu0 %v3040_v47  ;;  %2543 = vset.pattern.permute.xlu2 %v3020_v21 }
 0x133   : > { %2542 = vset.pattern.permute.xlu1 %v3023_v22 }
 0x13a   : > { %930 = vperm.xlu0 %2556, %v907_v53   ;;  %849 = vperm.xlu2 %2543, %v832_v49  }
 0x13b   : > { %843 = vperm.xlu1 %2542, %v832_v49  }
 0x142   : > { %2545 = vset.pattern.permute.xlu2 %v3013_v16  ;;  %2562 = vset.pattern.permute.xlu0 %v3948_v54 }
 0x143   : > { %2544 = vset.pattern.permute.xlu1 %v3040_v47 }
 0x144   : > { %v3083_v9 = vpop.permute.xlu2 %768 }
 0x14a   : > { %862 = vperm.xlu2 %2545, %v857_v50  }
 0x14b   : > { %855 = vperm.xlu1 %2544, %v832_v49  }
 0x152   : > { %2548 = vset.pattern.permute.xlu2 %v3040_v47 }
 0x153   : > { %2547 = vset.pattern.permute.xlu1 %v3020_v21 }
 0x154   : > { %v3085_v13 = vpop.permute.xlu2 %787 }
 0x15a   : > { %880 = vperm.xlu2 %2548, %v857_v50  }
 0x15b   : > { %874 = vperm.xlu1 %2547, %v857_v50   ;;  %v3144_v50 = vld [vmem:[%s3937_s5 + $0x8] sm:$0xff] }
 0x15c   : > { %v3100_v26 = vpop.permute.xlu0 %774 }
 0x15d   : > { %v3094_v20 = vpop.permute.xlu1 %762 }
 0x162   : > { %2550 = vset.pattern.permute.xlu2 %v3023_v22 }
 0x163   : > { %2549 = vset.pattern.permute.xlu1 %v3013_v16 }
 0x164   : > { %v3089_v15 = vpop.permute.xlu2 %799 }
 0x168   : > { %v3070_v55 = vpop.f32.mrf.mxu1 }
 0x169   : > { %v506_v56 = vand.u32 2147483647, %v3070_v55  ;;  %v505_v63 = vmax.f32 %v3070_v55, 0.0 }
 0x16a   : > { %893 = vperm.xlu2 %2550, %v882_v52  }
 0x16b   : > { %v507_v57 = vsub.f32 0.0, %v506_v56  ;;  %887 = vperm.xlu1 %2549, %v882_v52  }
 0x16c   : > { %v3106_v31 = vpop.permute.xlu0 %805 }
 0x16d   : > { %v508_v58 = vmul.f32 1.442695, %v507_v57  ;;  %v3098_v25 = vpop.permute.xlu1 %780 }
 0x16f   : > { %2574 = vpow2.f32 %v508_v58 }
 0x170   : > { %v503_v59 = vpop.f32.mrf.mxu1 }
 0x172   : > { %2553 = vset.pattern.permute.xlu2 %v3013_v16 }
 0x173   : > { %2552 = vset.pattern.permute.xlu1 %v3040_v47 }
 0x174   : > { %v3092_v19 = vpop.permute.xlu2 %818 }
 0x175   : > { %v2575_v60 = vpop.eup %2574 }
 0x176   : > { %v510_v61 = vadd.f32 1.0, %v2575_v60 }
 0x178   : > { %2576 = vlog2.f32 %v510_v61 }
 0x17a   : > { %912 = vperm.xlu2 %2553, %v907_v53  }
 0x17b   : > { %905 = vperm.xlu1 %2552, %v882_v52   ;;  %v3154_v52 = vld [vmem:[%s3937_s5 + $0x18] sm:$0xff] }
 0x17c   : > { %v3112_v36 = vpop.permute.xlu0 %837 }
 0x17d   : > { %v3104_v30 = vpop.permute.xlu1 %793 }
 0x17e   : > { %v2577_v62 = vpop.eup %2576 }
 0x17f   : > { %v512_v0 = vmul.f32 0.6931472, %v2577_v62 }
 0x181   : > { %v513_v1 = vadd.f32 %v512_v0, %v505_v63 }
 0x182   : > { %2555 = vset.pattern.permute.xlu2 %v3020_v21 }
 0x183   : > { %2554 = vset.pattern.permute.xlu1 %v3023_v22  ;;  %v526_v2 = vperm.slane %v513_v1, 0  ;;  %v519_v3 = vrot.slane %v513_v1, 1  ;;  %v522_v5 = vrot.slane %v513_v1, 4  ;;  %v525_v7 = vrot.slane %v513_v1, 7 }
 0x184   : > { %v524_v10 = vrot.slane %v513_v1, 6  ;;  %v520_v14 = vrot.slane %v513_v1, 2  ;;  %v521_v17 = vrot.slane %v513_v1, 3  ;;  %v523_v18 = vrot.slane %v513_v1, 5  ;;  %v3096_v24 = vpop.permute.xlu2 %830 }
 0x185   : > { %535 = vperm.xlu0 %2562, %v526_v2   ;;  %v527_v8 = vperm.slane %v519_v3, 0  ;;  %v530_v27 = vperm.slane %v522_v5, 0  ;;  %v533_v33 = vperm.slane %v525_v7, 0 }
 0x186   : > { %v532_v11 = vperm.slane %v524_v10, 0  ;;  %v528_v23 = vperm.slane %v520_v14, 0  ;;  %v529_v28 = vperm.slane %v521_v17, 0  ;;  %v531_v32 = vperm.slane %v523_v18, 0 }
 0x18a   : > { %924 = vperm.xlu2 %2555, %v907_v53  }
 0x18b   : > { %918 = vperm.xlu1 %2554, %v907_v53  }
 0x18c   : > { %v3118_v39 = vpop.permute.xlu0 %868 }
 0x18d   : > { %715 = vperm.xlu0 %2562, %v519_v3   ;;  %v3110_v35 = vpop.permute.xlu1 %812 }
 0x192   : > { %2558 = vset.pattern.permute.xlu2 %v3023_v22 }
 0x193   : > { %2557 = vset.pattern.permute.xlu1 %v3013_v16 }
 0x194   : > { %v3102_v29 = vpop.permute.xlu2 %849 }
 0x195   : > { %730 = vperm.xlu0 %2562, %v522_v5  }
 0x19a   : > { %943 = vperm.xlu2 %2558, %v932_v6  }
 0x19b   : > { %937 = vperm.xlu1 %2557, %v932_v6  }
 0x19c   : > { %v3124_v42 = vpop.permute.xlu0 %899 }
 0x19d   : > { %745 = vperm.xlu0 %2562, %v525_v7   ;;  %v3116_v38 = vpop.permute.xlu1 %824 }
 0x1a2   : > { %2560 = vset.pattern.permute.xlu2 %v3040_v47 }
 0x1a3   : > { %2559 = vset.pattern.permute.xlu1 %v3020_v21 }
 0x1a4   : > { %v3108_v34 = vpop.permute.xlu2 %862 }
 0x1a5   : > { %539 = vperm.xlu0 %2562, %v527_v8  }
 0x1aa   : > { %955 = vperm.xlu2 %2560, %v932_v6  }
 0x1ab   : > { %949 = vperm.xlu1 %2559, %v932_v6  }
 0x1ac   : > { %v3130_v45 = vpop.permute.xlu0 %930 }
 0x1ad   : > { %559 = vperm.xlu0 %2562, %v532_v11   ;;  %v3122_v41 = vpop.permute.xlu1 %843 }
 0x1b2   : > { %2561 = vset.pattern.permute.xlu2 %v3948_v54 }
 0x1b3   : > { %2563 = vset.pattern.permute.xlu1 %v3948_v54  ;;  %710 = vperm.xlu2 %2561, %v513_v1  }
 0x1b4   : > { %720 = vperm.xlu1 %2563, %v520_v14   ;;  %v3114_v37 = vpop.permute.xlu2 %880 }
 0x1b5   : > { %2564 = vset.pattern.permute.xlu0 %v3040_v47 }
 0x1bb   : > { %725 = vperm.xlu2 %2561, %v521_v17  }
 0x1bc   : > { %735 = vperm.xlu1 %2563, %v523_v18  }
 0x1bd   : > { %v3128_v44 = vpop.permute.xlu1 %855 }
 0x1c3   : > { %740 = vperm.xlu2 %2561, %v524_v10  }
 0x1c4   : > { %543 = vperm.xlu1 %2563, %v528_v23   ;;  %v3120_v40 = vpop.permute.xlu2 %893 }
 0x1cb   : > { %551 = vperm.xlu2 %2561, %v530_v27  }
 0x1cc   : > { %547 = vperm.xlu1 %2563, %v529_v28  }
 0x1cd   : > { %v3139_v49 = vpop.permute.xlu1 %874 }
 0x1d3   : > { %555 = vperm.xlu2 %2561, %v531_v32   ;;  %v701_v32 = vrot.slane %v3070_v55, 7 }
 0x1d4   : > { %563 = vperm.xlu1 %2563, %v533_v33   ;;  %v3126_v43 = vpop.permute.xlu2 %912 }
 0x1dd   : > { %v3160_v1 = vpop.permute.xlu1 %887 }
 0x1e4   : > { %v3132_v46 = vpop.permute.xlu2 %924 }
 0x1ed   : > { %v3164_v10 = vpop.permute.xlu1 %905 }
 0x1f4   : > { %v944_v0 = vpop.permute.xlu2 %943 }
 0x1f7   : > { %v536_v53 = vpop.permute.xlu0 %535 }
 0x1f8   : > { %v566_v56 = vmul.f32 %v536_v53, %v3137_v48  ;;  %v567_v57 = vmul.f32 %v536_v53, %v3144_v50  ;;  %v568_v58 = vmul.f32 %v536_v53, %v3149_v51  ;;  %v569_v59 = vmul.f32 %v536_v53, %v3154_v52 }
 0x1f9   : > { %v695_v53 = vrot.slane %v3070_v55, 1 }
 0x1fa   : > { %v598_v60 = vmul.f32 1.442695, %v566_v56  ;;  %v600_v61 = vmul.f32 1.442695, %v567_v57  ;;  %v602_v62 = vmul.f32 1.442695, %v568_v58 }
 0x1fb   : > { %v604_v63 = vmul.f32 1.442695, %v569_v59 }
 0x1fc   : > { %2578 = vpow2.f32 %v598_v60 }
 0x1fd   : > { %2580 = vpow2.f32 %v600_v61  ;;  %v3170_v14 = vpop.permute.xlu1 %918 }
 0x1fe   : > { %2582 = vpow2.f32 %v602_v62 }
 0x1ff   : > { %2584 = vpow2.f32 %v604_v63  ;;  %v716_v2 = vpop.permute.xlu0 %715 }
 0x200   : > { %v718_v23 = vperm.slane %v716_v2, 0 }
 0x202   : > { %v2579_v3 = vpop.eup %2578  ;;  %v750_v58 = vmul.f32 %v718_v23, %v695_v53 }
 0x203   : > { %v2581_v5 = vpop.eup %2580  ;;  %662 = vst.msk [vmem:[#allocation4] sm:$0xff] %vm406_vm2, %v2579_v3 }
 0x204   : > { %v2583_v6 = vpop.eup %2582  ;;  %663 = vst.msk [vmem:[#allocation4 + $0x8] sm:$0xff] %vm406_vm2, %v2581_v5  ;;  %v956_v7 = vpop.permute.xlu2 %955 }
 0x205   : > { %v2585_v8 = vpop.eup %2584  ;;  %664 = vst.msk [vmem:[#allocation4 + $0x10] sm:$0xff] %vm406_vm2, %v2583_v6 }
 0x206   : > { %665 = vst.msk [vmem:[#allocation4 + $0x18] sm:$0xff] %vm406_vm2, %v2585_v8 }
 0x207   : > { %v3168_v11 = vpop.permute.xlu0 %730 }
 0x20d   : > { %v711_v17 = vpop.permute.xlu2 %710  ;;  %v938_v63 = vpop.permute.xlu1 %937 }
 0x20e   : > { %v713_v18 = vperm.slane %v711_v17, 0 }
 0x20f   : > { %v746_v27 = vpop.permute.xlu0 %745 }
 0x210   : > { %v749_v28 = vmul.f32 %v713_v18, %v3070_v55  ;;  %v748_v33 = vperm.slane %v746_v27, 0 }
 0x212   : > { %v965_v56 = vperm.slane %v749_v28, 0  ;;  %v756_v57 = vmul.f32 %v748_v33, %v701_v32 }
 0x214   : > { %v972_v59 = vperm.slane %v756_v57, 0  ;;  %v983_v60 = vmul.f32 %v965_v56, %v3100_v26  ;;  %v982_v61 = vmul.f32 %v965_v56, %v3083_v9  ;;  %v981_v62 = vmul.f32 %v965_v56, %v3094_v20 }
 0x215   : > { %v3182_v2 = vpop.permute.xlu2 %725  ;;  %v966_v9 = vperm.slane %v750_v58, 0 }
 0x216   : > { %1049 = vrot.lane.b32.xlu2 %v983_v60, %s2850_s19  ;;  %1047 = vrot.lane.b32.xlu1 %v982_v61, %s2850_s19  ;;  %v3186_v3 = vmul.f32 %v972_v59, %v938_v63  ;;  %v3188_v5 = vmul.f32 %v972_v59, %v944_v0  ;;  %v3190_v6 = vmul.f32 %v972_v59, %v956_v7 }
 0x217   : > { %1045 = vrot.lane.b32.xlu0 %v981_v62, %s2850_s19  ;;  %v540_v26 = vpop.permute.xlu0 %539  ;;  %v986_v0 = vmul.f32 %v966_v9, %v3104_v30  ;;  %v985_v7 = vmul.f32 %v966_v9, %v3085_v13  ;;  %v984_v60 = vmul.f32 %v965_v56, %v3098_v25 }
 0x218   : > { %v570_v20 = vmul.f32 %v540_v26, %v3137_v48  ;;  %v571_v8 = vmul.f32 %v540_v26, %v3144_v50  ;;  %v572_v17 = vmul.f32 %v540_v26, %v3149_v51  ;;  %v573_v18 = vmul.f32 %v540_v26, %v3154_v52 }
 0x21a   : > { %v606_v23 = vmul.f32 1.442695, %v570_v20  ;;  %v608_v27 = vmul.f32 1.442695, %v571_v8  ;;  %v610_v28 = vmul.f32 1.442695, %v572_v17 }
 0x21b   : > { %v612_v33 = vmul.f32 1.442695, %v573_v18 }
 0x21c   : > { %2586 = vpow2.f32 %v606_v23  ;;  %v988_v23 = vmul.f32 %v966_v9, %v3106_v31  ;;  %v728_v31 = vperm.slane %v3182_v2, 0 }
 0x21d   : > { %2588 = vpow2.f32 %v608_v27  ;;  %v950_v57 = vpop.permute.xlu1 %949  ;;  %v3199_v58 = vpop.permute.xlu2 %740 }
 0x21e   : > { %2590 = vpow2.f32 %v610_v28  ;;  %v3202_v61 = vmul.f32 %v972_v59, %v950_v57  ;;  %1055 = vrot.lane.b32.xlu2 %v986_v0, %s2850_s19  ;;  %1053 = vrot.lane.b32.xlu1 %v985_v7, %s2850_s19  ;;  %v987_v0 = vmul.f32 %v966_v9, %v3089_v15 }
 0x21f   : > { %2592 = vpow2.f32 %v612_v33  ;;  %1051 = vrot.lane.b32.xlu0 %v984_v60, %s2850_s19  ;;  %v560_v62 = vpop.permute.xlu0 %559  ;;  %v696_v33 = vrot.slane %v3070_v55, 2 }
 0x220   : > { %v590_v30 = vmul.f32 %v560_v62, %v3137_v48  ;;  %v591_v13 = vmul.f32 %v560_v62, %v3144_v50  ;;  %v592_v63 = vmul.f32 %v560_v62, %v3149_v51  ;;  %v593_v26 = vmul.f32 %v560_v62, %v3154_v52 }
 0x222   : > { %v2587_v25 = vpop.eup %2586  ;;  %v646_v56 = vmul.f32 1.442695, %v590_v30  ;;  %v648_v59 = vmul.f32 1.442695, %v591_v13  ;;  %v650_v8 = vmul.f32 1.442695, %v592_v63 }
 0x223   : > { %v2589_v20 = vpop.eup %2588  ;;  %666 = vst.msk [vmem:[#allocation4 + $0x20] sm:$0xff] %vm406_vm2, %v2587_v25  ;;  %v652_v17 = vmul.f32 1.442695, %v593_v26 }
 0x224   : > { %v2591_v18 = vpop.eup %2590  ;;  %667 = vst.msk [vmem:[#allocation4 + $0x28] sm:$0xff] %vm406_vm2, %v2589_v20  ;;  %2594 = vpow2.f32 %v646_v56 }
 0x225   : > { %v2593_v27 = vpop.eup %2592  ;;  %668 = vst.msk [vmem:[#allocation4 + $0x30] sm:$0xff] %vm406_vm2, %v2591_v18  ;;  %2596 = vpow2.f32 %v648_v59  ;;  %v552_v28 = vpop.permute.xlu2 %551  ;;  %v697_v59 = vrot.slane %v3070_v55, 3 }
 0x226   : > { %669 = vst.msk [vmem:[#allocation4 + $0x38] sm:$0xff] %vm406_vm2, %v2593_v27  ;;  %2598 = vpow2.f32 %v650_v8  ;;  %v582_v7 = vmul.f32 %v552_v28, %v3137_v48  ;;  %v583_v57 = vmul.f32 %v552_v28, %v3144_v50  ;;  %v584_v60 = vmul.f32 %v552_v28, %v3149_v51  ;;  %v721_v62 = vpop.permute.xlu1 %720  ;;  %1059 = vrot.lane.b32.xlu1 %v988_v23, %s2850_s19 }
 0x227   : > { %2600 = vpow2.f32 %v652_v17  ;;  %v585_v30 = vmul.f32 %v552_v28, %v3154_v52  ;;  %v723_v13 = vperm.slane %v721_v62, 0  ;;  %1057 = vrot.lane.b32.xlu0 %v987_v0, %s2850_s19  ;;  %v752_v17 = vmul.f32 %v728_v31, %v697_v59 }
 0x228   : > { %v630_v15 = vmul.f32 1.442695, %v582_v7  ;;  %v632_v9 = vmul.f32 1.442695, %v583_v57  ;;  %v634_v63 = vmul.f32 1.442695, %v584_v60 }
 0x229   : > { %v636_v26 = vmul.f32 1.442695, %v585_v30  ;;  %v751_v25 = vmul.f32 %v723_v13, %v696_v33 }
 0x22a   : > { %v2595_v56 = vpop.eup %2594  ;;  %2602 = vpow2.f32 %v630_v15 }
 0x22b   : > { %v2597_v20 = vpop.eup %2596  ;;  %686 = vst.msk [vmem:[#allocation4 + $0xc0] sm:$0xff] %vm406_vm2, %v2595_v56  ;;  %2604 = vpow2.f32 %v632_v9  ;;  %v967_v2 = vperm.slane %v751_v25, 0  ;;  %v698_v56 = vrot.slane %v3070_v55, 4 }
 0x22c   : > { %v2599_v8 = vpop.eup %2598  ;;  %687 = vst.msk [vmem:[#allocation4 + $0xc8] sm:$0xff] %vm406_vm2, %v2597_v20  ;;  %2606 = vpow2.f32 %v634_v63  ;;  %v733_v63 = vperm.slane %v3168_v11, 0 }
 0x22d   : > { %v2601_v18 = vpop.eup %2600  ;;  %688 = vst.msk [vmem:[#allocation4 + $0xd0] sm:$0xff] %vm406_vm2, %v2599_v8  ;;  %2608 = vpow2.f32 %v636_v26  ;;  %v556_v23 = vpop.permute.xlu2 %555  ;;  %v989_v27 = vmul.f32 %v967_v2, %v3110_v35  ;;  %v991_v28 = vmul.f32 %v967_v2, %v3116_v38  ;;  %v990_v0 = vmul.f32 %v967_v2, %v3092_v19 }
 0x22e   : > { %689 = vst.msk [vmem:[#allocation4 + $0xd8] sm:$0xff] %vm406_vm2, %v2601_v18  ;;  %v586_v7 = vmul.f32 %v556_v23, %v3137_v48  ;;  %v587_v57 = vmul.f32 %v556_v23, %v3144_v50  ;;  %v588_v60 = vmul.f32 %v556_v23, %v3149_v51  ;;  %v589_v62 = vmul.f32 %v556_v23, %v3154_v52  ;;  %v3241_v31 = vpop.permute.xlu1 %735 }
 0x22f   : > { %1061 = vrot.lane.b32.xlu2 %v989_v27, %s2850_s19  ;;  %1065 = vrot.lane.b32.xlu1 %v991_v28, %s2850_s19  ;;  %v968_v26 = vperm.slane %v752_v17, 0  ;;  %v992_v20 = vmul.f32 %v967_v2, %v3096_v24  ;;  %v753_v8 = vmul.f32 %v733_v63, %v698_v56 }
 0x230   : > { %v2603_v35 = vpop.eup %2602  ;;  %v638_v38 = vmul.f32 1.442695, %v586_v7  ;;  %v640_v30 = vmul.f32 1.442695, %v587_v57  ;;  %v642_v19 = vmul.f32 1.442695, %v588_v60  ;;  %1063 = vrot.lane.b32.xlu0 %v990_v0, %s2850_s19 }
 0x231   : > { %v2605_v13 = vpop.eup %2604  ;;  %678 = vst.msk [vmem:[#allocation4 + $0x80] sm:$0xff] %vm406_vm2, %v2603_v35  ;;  %v644_v15 = vmul.f32 1.442695, %v589_v62  ;;  %v994_v17 = vmul.f32 %v968_v26, %v3122_v41  ;;  %v993_v18 = vmul.f32 %v968_v26, %v3112_v36  ;;  %v969_v57 = vperm.slane %v753_v8, 0 }
 0x232   : > { %v2607_v9 = vpop.eup %2606  ;;  %679 = vst.msk [vmem:[#allocation4 + $0x88] sm:$0xff] %vm406_vm2, %v2605_v13  ;;  %2610 = vpow2.f32 %v638_v38  ;;  %v995_v38 = vmul.f32 %v968_v26, %v3102_v29  ;;  %v996_v13 = vmul.f32 %v968_v26, %v3128_v44 }
 0x233   : > { %v2609_v25 = vpop.eup %2608  ;;  %680 = vst.msk [vmem:[#allocation4 + $0x90] sm:$0xff] %vm406_vm2, %v2607_v9  ;;  %2612 = vpow2.f32 %v640_v30 }
 0x234   : > { %681 = vst.msk [vmem:[#allocation4 + $0x98] sm:$0xff] %vm406_vm2, %v2609_v25  ;;  %2614 = vpow2.f32 %v642_v19  ;;  %v997_v19 = vmul.f32 %v969_v57, %v3108_v34 }
 0x235   : > { %2616 = vpow2.f32 %v644_v15 }
 0x236   : > { %v544_v11 = vpop.permute.xlu1 %543 }
 0x237   : > { %v574_v23 = vmul.f32 %v544_v11, %v3137_v48  ;;  %v575_v27 = vmul.f32 %v544_v11, %v3144_v50  ;;  %v576_v28 = vmul.f32 %v544_v11, %v3149_v51  ;;  %v577_v0 = vmul.f32 %v544_v11, %v3154_v52  ;;  %1067 = vrot.lane.b32.xlu2 %v992_v20, %s2850_s19 }
 0x238   : > { %v2611_v7 = vpop.eup %2610  ;;  %1071 = vrot.lane.b32.xlu1 %v994_v17, %s2850_s19  ;;  %1069 = vrot.lane.b32.xlu0 %v993_v18, %s2850_s19  ;;  %v738_v20 = vperm.slane %v3241_v31, 0  ;;  %v699_v11 = vrot.slane %v3070_v55, 5 }
 0x239   : > { %v2613_v24 = vpop.eup %2612  ;;  %682 = vst.msk [vmem:[#allocation4 + $0xa0] sm:$0xff] %vm406_vm2, %v2611_v7  ;;  %v614_v41 = vmul.f32 1.442695, %v574_v23  ;;  %v616_v36 = vmul.f32 1.442695, %v575_v27  ;;  %v998_v27 = vmul.f32 %v969_v57, %v3118_v39  ;;  %v999_v7 = vmul.f32 %v969_v57, %v3139_v49 }
 0x23a   : > { %v2615_v2 = vpop.eup %2614  ;;  %683 = vst.msk [vmem:[#allocation4 + $0xa8] sm:$0xff] %vm406_vm2, %v2613_v24  ;;  %v618_v60 = vmul.f32 1.442695, %v576_v28  ;;  %v620_v62 = vmul.f32 1.442695, %v577_v0  ;;  %v754_v31 = vmul.f32 %v738_v20, %v699_v11  ;;  %v1000_v0 = vmul.f32 %v969_v57, %v3114_v37 }
 0x23b   : > { %v2617_v35 = vpop.eup %2616  ;;  %684 = vst.msk [vmem:[#allocation4 + $0xb0] sm:$0xff] %vm406_vm2, %v2615_v2  ;;  %2618 = vpow2.f32 %v614_v41  ;;  %v700_v57 = vrot.slane %v3070_v55, 6 }
 0x23c   : > { %685 = vst.msk [vmem:[#allocation4 + $0xb8] sm:$0xff] %vm406_vm2, %v2617_v35  ;;  %2620 = vpow2.f32 %v616_v36 }
 0x23d   : > { %2622 = vpow2.f32 %v618_v60  ;;  %v970_v60 = vperm.slane %v754_v31, 0 }
 0x23e   : > { %2624 = vpow2.f32 %v620_v62  ;;  %v548_v30 = vpop.permute.xlu1 %547 }
 0x23f   : > { %v578_v15 = vmul.f32 %v548_v30, %v3137_v48  ;;  %v579_v9 = vmul.f32 %v548_v30, %v3144_v50  ;;  %v580_v63 = vmul.f32 %v548_v30, %v3149_v51  ;;  %v581_v25 = vmul.f32 %v548_v30, %v3154_v52  ;;  %1073 = vrot.lane.b32.xlu2 %v995_v38, %s2850_s19 }
 0x240   : > { %1077 = vrot.lane.b32.xlu1 %v997_v19, %s2850_s19  ;;  %1075 = vrot.lane.b32.xlu0 %v996_v13, %s2850_s19  ;;  %v1001_v38 = vmul.f32 %v970_v60, %v3160_v1  ;;  %v1003_v30 = vmul.f32 %v970_v60, %v3124_v42  ;;  %v1002_v19 = vmul.f32 %v970_v60, %v3120_v40 }
 0x241   : > { %v2619_v29 = vpop.eup %2618  ;;  %v622_v34 = vmul.f32 1.442695, %v578_v15  ;;  %v624_v8 = vmul.f32 1.442695, %v579_v9  ;;  %v626_v44 = vmul.f32 1.442695, %v580_v63  ;;  %v1004_v40 = vmul.f32 %v970_v60, %v3164_v10 }
 0x242   : > { %v2621_v26 = vpop.eup %2620  ;;  %670 = vst.msk [vmem:[#allocation4 + $0x40] sm:$0xff] %vm406_vm2, %v2619_v29  ;;  %v628_v17 = vmul.f32 1.442695, %v581_v25 }
 0x243   : > { %v2623_v18 = vpop.eup %2622  ;;  %671 = vst.msk [vmem:[#allocation4 + $0x48] sm:$0xff] %vm406_vm2, %v2621_v26  ;;  %2626 = vpow2.f32 %v622_v34 }
 0x244   : > { %v2625_v23 = vpop.eup %2624  ;;  %672 = vst.msk [vmem:[#allocation4 + $0x50] sm:$0xff] %vm406_vm2, %v2623_v18  ;;  %2628 = vpow2.f32 %v624_v8 }
 0x245   : > { %673 = vst.msk [vmem:[#allocation4 + $0x58] sm:$0xff] %vm406_vm2, %v2625_v23  ;;  %2630 = vpow2.f32 %v626_v44 }
 0x246   : > { %2632 = vpow2.f32 %v628_v17  ;;  %v564_v28 = vpop.permute.xlu1 %563 }
 0x247   : > { %v594_v24 = vmul.f32 %v564_v28, %v3137_v48  ;;  %v595_v41 = vmul.f32 %v564_v28, %v3144_v50  ;;  %v596_v36 = vmul.f32 %v564_v28, %v3149_v51  ;;  %v597_v2 = vmul.f32 %v564_v28, %v3154_v52  ;;  %1079 = vrot.lane.b32.xlu2 %v998_v27, %s2850_s19 }
 0x248   : > { %1083 = vrot.lane.b32.xlu1 %v1000_v0, %s2850_s19  ;;  %1081 = vrot.lane.b32.xlu0 %v999_v7, %s2850_s19  ;;  %v743_v48 = vperm.slane %v3199_v58, 0 }
 0x249   : > { %v2627_v39 = vpop.eup %2626  ;;  %v654_v62 = vmul.f32 1.442695, %v594_v24  ;;  %v656_v37 = vmul.f32 1.442695, %v595_v41  ;;  %v658_v35 = vmul.f32 1.442695, %v596_v36 }
 0x24a   : > { %v2629_v49 = vpop.eup %2628  ;;  %674 = vst.msk [vmem:[#allocation4 + $0x60] sm:$0xff] %vm406_vm2, %v2627_v39  ;;  %v660_v50 = vmul.f32 1.442695, %v597_v2  ;;  %v755_v58 = vmul.f32 %v743_v48, %v700_v57 }
 0x24b   : > { %v2631_v51 = vpop.eup %2630  ;;  %675 = vst.msk [vmem:[#allocation4 + $0x68] sm:$0xff] %vm406_vm2, %v2629_v49  ;;  %2634 = vpow2.f32 %v654_v62 }
 0x24c   : > { %v2633_v52 = vpop.eup %2632  ;;  %676 = vst.msk [vmem:[#allocation4 + $0x70] sm:$0xff] %vm406_vm2, %v2631_v51  ;;  %2636 = vpow2.f32 %v656_v37  ;;  %v971_v9 = vperm.slane %v755_v58, 0 }
 0x24d   : > { %677 = vst.msk [vmem:[#allocation4 + $0x78] sm:$0xff] %vm406_vm2, %v2633_v52  ;;  %2638 = vpow2.f32 %v658_v35 }
 0x24e   : > { %2640 = vpow2.f32 %v660_v50  ;;  %v1006_v42 = vmul.f32 %v971_v9, %v3170_v14  ;;  %v1005_v25 = vmul.f32 %v971_v9, %v3126_v43  ;;  %v1007_v20 = vmul.f32 %v971_v9, %v3132_v46 }
 0x24f   : > { %1085 = vrot.lane.b32.xlu2 %v1001_v38, %s2850_s19  ;;  %v1008_v29 = vmul.f32 %v971_v9, %v3130_v45 }
 0x250   : > { %1089 = vrot.lane.b32.xlu1 %v1003_v30, %s2850_s19  ;;  %1087 = vrot.lane.b32.xlu0 %v1002_v19, %s2850_s19 }
 0x251   : > { %v2635_v13 = vpop.eup %2634 }
 0x252   : > { %v2637_v15 = vpop.eup %2636  ;;  %690 = vst.msk [vmem:[#allocation4 + $0xe0] sm:$0xff] %vm406_vm2, %v2635_v13 }
 0x253   : > { %v2639_v1 = vpop.eup %2638  ;;  %691 = vst.msk [vmem:[#allocation4 + $0xe8] sm:$0xff] %vm406_vm2, %v2637_v15 }
 0x254   : > { %v2641_v63 = vpop.eup %2640  ;;  %692 = vst.msk [vmem:[#allocation4 + $0xf0] sm:$0xff] %vm406_vm2, %v2639_v1 }
 0x255   : > { %693 = vst.msk [vmem:[#allocation4 + $0xf8] sm:$0xff] %vm406_vm2, %v2641_v63 }
 0x257   : > { %1091 = vrot.lane.b32.xlu2 %v1004_v40, %s2850_s19 }
 0x258   : > { %1095 = vrot.lane.b32.xlu1 %v1006_v42, %s2850_s19  ;;  %1093 = vrot.lane.b32.xlu0 %v1005_v25, %s2850_s19 }
 0x25f   : > { %1097 = vrot.lane.b32.xlu2 %v1007_v20, %s2850_s19 }
 0x260   : > { %1101 = vrot.lane.b32.xlu1 %v3186_v3, %s2850_s19  ;;  %1099 = vrot.lane.b32.xlu0 %v1008_v29, %s2850_s19 }
 0x267   : > { %1103 = vrot.lane.b32.xlu2 %v3188_v5, %s2850_s19 }
 0x268   : > { %1107 = vrot.lane.b32.xlu1 %v3190_v6, %s2850_s19  ;;  %1105 = vrot.lane.b32.xlu0 %v3202_v61, %s2850_s19 }
 0x270   : > { %v1050_v43 = vpop.permute.xlu2 %1049 }
 0x271   : > { %1143 = vst.msk [vmem:[#allocation5 + $0x10] sm:$0xff] %vm406_vm2, %v1050_v43 }
 0x278   : > { %v1056_v45 = vpop.permute.xlu2 %1055 }
 0x279   : > { %1146 = vst.msk [vmem:[#allocation5 + $0x28] sm:$0xff] %vm406_vm2, %v1056_v45 }
 0x288   : > { %v1048_v46 = vpop.permute.xlu1 %1047 }
 0x289   : > { %1142 = vst.msk [vmem:[#allocation5 + $0x8] sm:$0xff] %vm406_vm2, %v1048_v46  ;;  %v1062_v10 = vpop.permute.xlu2 %1061  ;;  %v1046_v14 = vpop.permute.xlu0 %1045 }
 0x28a   : > { %1149 = vst.msk [vmem:[#allocation5 + $0x40] sm:$0xff] %vm406_vm2, %v1062_v10 }
 0x28b   : > { %1141 = vst.msk [vmem:[#allocation5] sm:$0xff] %vm406_vm2, %v1046_v14 }
 0x290   : > { %v1054_v3 = vpop.permute.xlu1 %1053 }
 0x291   : > { %v1068_v5 = vpop.permute.xlu2 %1067  ;;  %1145 = vst.msk [vmem:[#allocation5 + $0x20] sm:$0xff] %vm406_vm2, %v1054_v3  ;;  %v1052_v6 = vpop.permute.xlu0 %1051 }
 0x292   : > { %1152 = vst.msk [vmem:[#allocation5 + $0x58] sm:$0xff] %vm406_vm2, %v1068_v5 }
 0x293   : > { %1144 = vst.msk [vmem:[#allocation5 + $0x18] sm:$0xff] %vm406_vm2, %v1052_v6 }
 0x298   : > { %v1060_v61 = vpop.permute.xlu1 %1059 }
 0x299   : > { %v1074_v34 = vpop.permute.xlu2 %1073  ;;  %1148 = vst.msk [vmem:[#allocation5 + $0x38] sm:$0xff] %vm406_vm2, %v1060_v61  ;;  %v1058_v8 = vpop.permute.xlu0 %1057 }
 0x29a   : > { %1155 = vst.msk [vmem:[#allocation5 + $0x70] sm:$0xff] %vm406_vm2, %v1074_v34 }
 0x29b   : > { %1147 = vst.msk [vmem:[#allocation5 + $0x30] sm:$0xff] %vm406_vm2, %v1058_v8 }
 0x2a1   : > { %v1066_v44 = vpop.permute.xlu1 %1065  ;;  %v1080_v26 = vpop.permute.xlu2 %1079 }
 0x2a2   : > { %1151 = vst.msk [vmem:[#allocation5 + $0x50] sm:$0xff] %vm406_vm2, %v1066_v44  ;;  %v1064_v17 = vpop.permute.xlu0 %1063 }
 0x2a3   : > { %1158 = vst.msk [vmem:[#allocation5 + $0x88] sm:$0xff] %vm406_vm2, %v1080_v26 }
 0x2a4   : > { %1150 = vst.msk [vmem:[#allocation5 + $0x48] sm:$0xff] %vm406_vm2, %v1064_v17 }
 0x2a9   : > { %v1086_v18 = vpop.permute.xlu2 %1085 }
 0x2aa   : > { %v1072_v23 = vpop.permute.xlu1 %1071  ;;  %1161 = vst.msk [vmem:[#allocation5 + $0xa0] sm:$0xff] %vm406_vm2, %v1086_v18  ;;  %v1070_v31 = vpop.permute.xlu0 %1069 }
 0x2ab   : > { %1154 = vst.msk [vmem:[#allocation5 + $0x68] sm:$0xff] %vm406_vm2, %v1072_v23 }
 0x2ac   : > { %1153 = vst.msk [vmem:[#allocation5 + $0x60] sm:$0xff] %vm406_vm2, %v1070_v31 }
 0x2b1   : > { %v1092_v27 = vpop.permute.xlu2 %1091 }
 0x2b2   : > { %1164 = vst.msk [vmem:[#allocation5 + $0xb8] sm:$0xff] %vm406_vm2, %v1092_v27  ;;  %v1078_v28 = vpop.permute.xlu1 %1077  ;;  %v1076_v0 = vpop.permute.xlu0 %1075 }
 0x2b3   : > { %1157 = vst.msk [vmem:[#allocation5 + $0x80] sm:$0xff] %vm406_vm2, %v1078_v28 }
 0x2b4   : > { %1156 = vst.msk [vmem:[#allocation5 + $0x78] sm:$0xff] %vm406_vm2, %v1076_v0 }
 0x2b9   : > { %v1098_v7 = vpop.permute.xlu2 %1097 }
 0x2ba   : > { %1167 = vst.msk [vmem:[#allocation5 + $0xd0] sm:$0xff] %vm406_vm2, %v1098_v7  ;;  %v1084_v24 = vpop.permute.xlu1 %1083  ;;  %v1082_v41 = vpop.permute.xlu0 %1081 }
 0x2bb   : > { %1160 = vst.msk [vmem:[#allocation5 + $0x98] sm:$0xff] %vm406_vm2, %v1084_v24 }
 0x2bc   : > { %1159 = vst.msk [vmem:[#allocation5 + $0x90] sm:$0xff] %vm406_vm2, %v1082_v41 }
 0x2c1   : > { %v1104_v36 = vpop.permute.xlu2 %1103 }
 0x2c2   : > { %v1090_v2 = vpop.permute.xlu1 %1089  ;;  %1170 = vst.msk [vmem:[#allocation5 + $0xe8] sm:$0xff] %vm406_vm2, %v1104_v36  ;;  %v1088_v60 = vpop.permute.xlu0 %1087 }
 0x2c3   : > { %1163 = vst.msk [vmem:[#allocation5 + $0xb0] sm:$0xff] %vm406_vm2, %v1090_v2 }
 0x2c4   : > { %1162 = vst.msk [vmem:[#allocation5 + $0xa8] sm:$0xff] %vm406_vm2, %v1088_v60 }
 0x2ca   : > { %v1096_v39 = vpop.permute.xlu1 %1095  ;;  %v1094_v62 = vpop.permute.xlu0 %1093 }
 0x2cb   : > { %1166 = vst.msk [vmem:[#allocation5 + $0xc8] sm:$0xff] %vm406_vm2, %v1096_v39 }
 0x2cc   : > { %1165 = vst.msk [vmem:[#allocation5 + $0xc0] sm:$0xff] %vm406_vm2, %v1094_v62 }
 0x2d2   : > { %v1102_v37 = vpop.permute.xlu1 %1101  ;;  %v1100_v35 = vpop.permute.xlu0 %1099 }
 0x2d3   : > { %1169 = vst.msk [vmem:[#allocation5 + $0xe0] sm:$0xff] %vm406_vm2, %v1102_v37 }
 0x2d4   : > { %1168 = vst.msk [vmem:[#allocation5 + $0xd8] sm:$0xff] %vm406_vm2, %v1100_v35 }
 0x2da   : > { %v1108_v49 = vpop.permute.xlu1 %1107  ;;  %v1106_v48 = vpop.permute.xlu0 %1105 }
 0x2db   : > { %1172 = vst.msk [vmem:[#allocation5 + $0xf8] sm:$0xff] %vm406_vm2, %v1108_v49 }
 0x2dc   : > { %1171 = vst.msk [vmem:[#allocation5 + $0xf0] sm:$0xff] %vm406_vm2, %v1106_v48 }
 0x2dd LB: >> { %s2414_s3 = sshll.u32 %s2845_s22, 5  ;;  %v1185_v50 = vld [vmem:[#allocation3] sm:$0xff]  ;;  %v1186_v51 = vld [vmem:[#allocation3 + $0x8] sm:$0xff]  ;;  %v1187_v52 = vld [vmem:[#allocation3 + $0x10] sm:$0xff]  ;;  %s1178_s22 = sadd.s32 1, %s2845_s22   ;;  %s2845_s22 = sphi %s3364_s22, %s1178_s22  }
 0x2de   : >> { %v1188_v38 = vld [vmem:[#allocation3 + $0x18] sm:$0xff]  ;;  %s1180_s15 = scalar_lea.vmem [#allocation4], %s2414_s3  ;;  %s1193_s20 = scalar_lea.vmem [#allocation5], %s2414_s3 }
 0x2df   : >> { %v1181_v58 = vld [vmem:[%s1180_s15] sm:$0xff]  ;;  %v1182_v19 = vld [vmem:[%s1180_s15 + $0x8] sm:$0xff]  ;;  %v1183_v1 = vld [vmem:[%s1180_s15 + $0x10] sm:$0xff]  ;;  %p1175_p5 = scmp.ge.s32.totalorder %s1178_s22, 8  }
 0x2e0   : >> { %v1189_v13 = vmul.f32 %v1185_v50, %v1181_v58  ;;  %v1190_v15 = vmul.f32 %v1186_v51, %v1182_v19  ;;  %v1191_v63 = vmul.f32 %v1187_v52, %v1183_v1  ;;  %v1184_v42 = vld [vmem:[%s1180_s15 + $0x18] sm:$0xff]  ;;  %v1242_v10 = vperm.slane (%p1175_p5), %v3070_v55, 0  ;;  %2642 = vset.pattern.permute.xlu0 (%p1175_p5), %v3013_v16  ;;  %2643 = vset.pattern.permute.xlu1 (%p1175_p5), %v3023_v22  ;;  %s2851_s25 = smov (%p1175_p5), 111   ;;  %s2425_s22 = sshll.u32 (%p1175_p5), %s2829_s13, 1 }
 0x2e1   : >> { %v1192_v29 = vmul.f32 %v1188_v38, %v1184_v42  ;;  %v1244_v14 = vperm.slane (%p1175_p5), %v696_v33, 0  ;;  %v1246_v3 = vperm.slane (%p1175_p5), %v698_v56, 0  ;;  %2644 = vset.pattern.permute.xlu2 (%p1175_p5), %v3020_v21  ;;  %v1243_v5 = vperm.slane (%p1175_p5), %v695_v53, 0  ;;  %s2253_s3 = sadd.s32 (%p1175_p5), %s2825_s12, %s2425_s22  ;;  %s2257_s14 = sshll.u32 (%p1175_p5), %s363_s11, 4  ;;  %s2258_s14 = int_to_ptr.vmem [resolvable:$true] %s2257_s14 }
 0x2e2   : > { %1250 = vrot.lane.b32.xlu0 (%p1175_p5), %v1242_v10, %s2851_s25  ;;  %v1245_v6 = vperm.slane (%p1175_p5), %v697_v59, 0  ;;  %v1247_v33 = vperm.slane (%p1175_p5), %v699_v11, 0  ;;  %v1248_v56 = vperm.slane (%p1175_p5), %v700_v57, 0  ;;  %v1249_v61 = vperm.slane (%p1175_p5), %v701_v32, 0  ;;  %s2426_s15 = sshll.u32 (%p1175_p5), %s2253_s3, 3  ;;  %s2238_s27 = scalar_lea.sflag (%p1175_p5), [#allocation8], %s361_s17 }
 0x2e3   : >> { %v1194_v30 = vld [vmem:[%s1193_s20] sm:$0xff]  ;;  %v1195_v9 = vld [vmem:[%s1193_s20 + $0x8] sm:$0xff]  ;;  %v1196_v40 = vld [vmem:[%s1193_s20 + $0x10] sm:$0xff]  ;;  %1254 = vrot.lane.b32.xlu1 (%p1175_p5), %v1244_v14, %s2851_s25  ;;  %vm2126_vm13 = vcmask (%p1175_p5), 130112   ;;  %vm2130_vm14 = vcmask (%p1175_p5), 195712   ;;  %vm2134_vm15 = vcmask (%p1175_p5), 261312   ;;  %s2255_s18 = scalar_lea.hbm (%p1175_p5), %s3940_s8, %s2426_s15 }
 0x2e4   : >> { %v1198_v25 = vadd.f32 %v1194_v30, %v1189_v13  ;;  %v1199_v20 = vadd.f32 %v1195_v9, %v1190_v15  ;;  %v1197_v43 = vld [vmem:[%s1193_s20 + $0x18] sm:$0xff]  ;;  %v1200_v45 = vadd.f32 %v1196_v40, %v1191_v63  ;;  %1258 = vrot.lane.b32.xlu2 (%p1175_p5), %v1246_v3, %s2851_s25  ;;  %vm2185_vm0 = vcmask (%p1175_p5), 1041409   ;;  %s2259_s26 = sshll.u32 (%p1175_p5), %s2255_s18, 4  ;;  %s2759_s19 = scalar_lea.hbm (%p1175_p5), %s3940_s8, 32  ;;  %s2260_s26 = int_to_ptr.hbm [resolvable:$true] %s2259_s26 }
 0x2e5   : >> { %v1201_v46 = vadd.f32 %v1197_v43, %v1192_v29  ;;  %vm2187_vm1 = vcmask (%p1175_p5), 1042434   ;;  %vm2189_vm4 = vcmask (%p1175_p5), 1043459   ;;  %vm2191_vm5 = vcmask (%p1175_p5), 1044484  }
 0x2e6   : >> { %1202 = vst.msk [vmem:[#allocation3] sm:$0xff] %vm406_vm2, %v1198_v25  ;;  %vm2193_vm6 = vcmask (%p1175_p5), 1045509   ;;  %vm2195_vm7 = vcmask (%p1175_p5), 1046534   ;;  %vm2197_vm8 = vcmask (%p1175_p5), 1047559  }
 0x2e7   : >> { %1206 = vst.msk [vmem:[%s1193_s20] sm:$0xff] %vm406_vm2, %v1198_v25 }
 0x2e8   : >> { %1203 = vst.msk [vmem:[#allocation3 + $0x8] sm:$0xff] %vm406_vm2, %v1199_v20 }
 0x2e9   : >> { %1207 = vst.msk [vmem:[%s1193_s20 + $0x8] sm:$0xff] %vm406_vm2, %v1199_v20 }
 0x2ea   : >> { %1204 = vst.msk [vmem:[#allocation3 + $0x10] sm:$0xff] %vm406_vm2, %v1200_v45  ;;  %1252 = vrot.lane.b32.xlu0 (%p1175_p5), %v1243_v5, %s2851_s25 }
 0x2eb   : >> { %1208 = vst.msk [vmem:[%s1193_s20 + $0x10] sm:$0xff] %vm406_vm2, %v1200_v45  ;;  %1256 = vrot.lane.b32.xlu1 (%p1175_p5), %v1245_v6, %s2851_s25 }
 0x2ec   : >> { %1205 = vst.msk [vmem:[#allocation3 + $0x18] sm:$0xff] %vm406_vm2, %v1201_v46  ;;  %1260 = vrot.lane.b32.xlu2 (%p1175_p5), %v1247_v33, %s2851_s25 }
 0x2ed   : >> { %1209 = vst.msk [vmem:[%s1193_s20 + $0x18] sm:$0xff] %vm406_vm2, %v1201_v46 }
 0x2ef   : > { %1177 = sbr.rel (!%p1175_p5) target bundleno = 733 (0x2dd), region = 117 }
 0x2f2   : > { %1262 = vrot.lane.b32.xlu0 (%p1175_p5), %v1248_v56, %s2851_s25 }
 0x2f3   : > { %1264 = vrot.lane.b32.xlu1 (%p1175_p5), %v1249_v61, %s2851_s25 }
 0x2f4   : > { %v1212_v34 = vld [vmem:[#allocation5 + $0x10] sm:$0xff]  ;;  %v1211_v8 = vld [vmem:[#allocation5 + $0x8] sm:$0xff]  ;;  %v1210_v53 = vld [vmem:[#allocation5] sm:$0xff] }
 0x2f5   : > { %v1213_v55 = vld [vmem:[#allocation5 + $0x18] sm:$0xff]  ;;  %v1216_v32 = vld [vmem:[#allocation5 + $0x30] sm:$0xff]  ;;  %v1215_v57 = vld [vmem:[#allocation5 + $0x28] sm:$0xff] }
 0x2f6   : > { %v1219_v24 = vld [vmem:[#allocation5 + $0x48] sm:$0xff]  ;;  %v1218_v41 = vld [vmem:[#allocation5 + $0x40] sm:$0xff]  ;;  %v1221_v38 = vld [vmem:[#allocation5 + $0x58] sm:$0xff] }
 0x2f7   : > { %v1214_v37 = vld [vmem:[#allocation5 + $0x20] sm:$0xff]  ;;  %v1217_v30 = vld [vmem:[#allocation5 + $0x38] sm:$0xff]  ;;  %v1224_v40 = vld [vmem:[#allocation5 + $0x70] sm:$0xff] }
 0x2f8   : > { %v1222_v51 = vld [vmem:[#allocation5 + $0x60] sm:$0xff]  ;;  %v1225_v63 = vld [vmem:[#allocation5 + $0x78] sm:$0xff]  ;;  %v1220_v42 = vld [vmem:[#allocation5 + $0x50] sm:$0xff] }
 0x2f9   : > { %v1228_v45 = vld [vmem:[#allocation5 + $0x90] sm:$0xff]  ;;  %v1227_v46 = vld [vmem:[#allocation5 + $0x88] sm:$0xff] }
 0x2fa   : > { %v1223_v33 = vld [vmem:[#allocation5 + $0x68] sm:$0xff] }
 0x33e   : > { %v1259_v43 = vpop.permute.xlu2 %1258 }
 0x33f   : > { %v1292_v5 = vmul.f32 %v1259_v43, %v1228_v45  ;;  %v1291_v6 = vmul.f32 %v1259_v43, %v1227_v46 }
 0x341   : > { %v1360_v61 = vsel %vm406_vm2, %v1292_v5, 0.0  ;;  %v1672_v5 = vsub.f32 0.0, %v2999_v4 }
 0x354   : > { %v1251_v44 = vpop.permute.xlu0 %1250 }
 0x355   : > { %v1276_v26 = vmul.f32 %v1251_v44, %v1212_v34  ;;  %v1275_v59 = vmul.f32 %v1251_v44, %v1211_v8  ;;  %v1274_v17 = vmul.f32 %v1251_v44, %v1210_v53  ;;  %v1277_v27 = vmul.f32 %v1251_v44, %v1213_v55  ;;  %v1255_v28 = vpop.permute.xlu1 %1254  ;;  %v1261_v8 = vpop.permute.xlu2 %1260  ;;  %v1231_v53 = vld [vmem:[#allocation5 + $0xa8] sm:$0xff]  ;;  %v1230_v44 = vld [vmem:[#allocation5 + $0xa0] sm:$0xff] }
 0x356   : > { %v1283_v39 = vmul.f32 %v1255_v28, %v1219_v24  ;;  %v1282_v62 = vmul.f32 %v1255_v28, %v1218_v41  ;;  %v1285_v19 = vmul.f32 %v1255_v28, %v1221_v38  ;;  %v1284_v29 = vmul.f32 %v1255_v28, %v1220_v42 }
 0x357   : > { %v1312_v11 = vsel %vm406_vm2, %v1276_v26, 0.0  ;;  %v1309_v18 = vsel %vm406_vm2, %v1275_v59, 0.0  ;;  %v1306_v23 = vsel %vm406_vm2, %v1274_v17, 0.0  ;;  %v1315_v60 = vsel %vm406_vm2, %v1277_v27, 0.0  ;;  %v1233_v27 = vld [vmem:[#allocation5 + $0xb8] sm:$0xff] }
 0x358   : > { %1313 = vadd.xlane.f32.xlu1 %v1312_v11  ;;  %1310 = vadd.xlane.f32.xlu0 %v1309_v18  ;;  %v1333_v49 = vsel %vm406_vm2, %v1283_v39, 0.0  ;;  %v1330_v48 = vsel %vm406_vm2, %v1282_v62, 0.0  ;;  %v1339_v9 = vsel %vm406_vm2, %v1285_v19, 0.0  ;;  %v1336_v3 = vsel %vm406_vm2, %v1284_v29, 0.0  ;;  %v1226_v11 = vld [vmem:[#allocation5 + $0x80] sm:$0xff]  ;;  %v1236_v39 = vld [vmem:[#allocation5 + $0xd0] sm:$0xff] }
 0x359   : > { %1307 = vadd.xlane.f32.xlu2 %v1306_v23  ;;  %v1357_v34 = vsel %vm406_vm2, %v1291_v6, 0.0  ;;  %v1295_v59 = vmul.f32 %v1261_v8, %v1231_v53  ;;  %v1294_v17 = vmul.f32 %v1261_v8, %v1230_v44  ;;  %v1290_v18 = vmul.f32 %v1259_v43, %v1226_v11  ;;  %v1232_v62 = vld [vmem:[#allocation5 + $0xb0] sm:$0xff]  ;;  %v1241_v29 = vld [vmem:[#allocation5 + $0xf8] sm:$0xff] }
 0x35a   : > { %v1673_v6 = vmul.f32 1.442695, %v1672_v5 }
 0x35b   : > { %v1369_v23 = vsel %vm406_vm2, %v1295_v59, 0.0  ;;  %v1366_v55 = vsel %vm406_vm2, %v1294_v17, 0.0 }
 0x35c   : > { %v1253_v31 = vpop.permute.xlu0 %1252  ;;  %2705 = vpow2.f32 %v1673_v6 }
 0x35d   : > { %v1280_v0 = vmul.f32 %v1253_v31, %v1216_v32  ;;  %v1279_v7 = vmul.f32 %v1253_v31, %v1215_v57  ;;  %v1278_v35 = vmul.f32 %v1253_v31, %v1214_v37  ;;  %v1257_v50 = vpop.permute.xlu1 %1256  ;;  %v1281_v13 = vmul.f32 %v1253_v31, %v1217_v30  ;;  %v1234_v57 = vld [vmem:[#allocation5 + $0xc0] sm:$0xff] }
 0x35e   : > { %v1286_v58 = vmul.f32 %v1257_v50, %v1222_v51  ;;  %v1289_v25 = vmul.f32 %v1257_v50, %v1225_v63  ;;  %v1288_v20 = vmul.f32 %v1257_v50, %v1224_v40  ;;  %v1287_v56 = vmul.f32 %v1257_v50, %v1223_v33  ;;  %v1240_v50 = vld [vmem:[#allocation5 + $0xf0] sm:$0xff]  ;;  %v1239_v51 = vld [vmem:[#allocation5 + $0xe8] sm:$0xff]  ;;  %v1238_v40 = vld [vmem:[#allocation5 + $0xe0] sm:$0xff] }
 0x35f   : > { %v1324_v36 = vsel %vm406_vm2, %v1280_v0, 0.0  ;;  %v1321_v2 = vsel %vm406_vm2, %v1279_v7, 0.0  ;;  %v1318_v52 = vsel %vm406_vm2, %v1278_v35, 0.0  ;;  %v1327_v1 = vsel %vm406_vm2, %v1281_v13, 0.0  ;;  %v1229_v0 = vld [vmem:[#allocation5 + $0x98] sm:$0xff]  ;;  %v1235_v13 = vld [vmem:[#allocation5 + $0xc8] sm:$0xff] }
 0x360   : > { %1325 = vadd.xlane.f32.xlu1 %v1324_v36  ;;  %1322 = vadd.xlane.f32.xlu0 %v1321_v2  ;;  %v1342_v15 = vsel %vm406_vm2, %v1286_v58, 0.0  ;;  %v1351_v10 = vsel %vm406_vm2, %v1289_v25, 0.0  ;;  %v1348_v14 = vsel %vm406_vm2, %v1288_v20, 0.0  ;;  %v1345_v26 = vsel %vm406_vm2, %v1287_v56, 0.0  ;;  %v2704_v20 = vld [vmem:[%s3938_s6] ss:$0 sm:$0xff] }
 0x361   : > { %1316 = vadd.xlane.f32.xlu2 %v1315_v60  ;;  %v1354_v31 = vsel %vm406_vm2, %v1290_v18, 0.0  ;;  %v1297_v7 = vmul.f32 %v1261_v8, %v1233_v27  ;;  %v1293_v24 = vmul.f32 %v1259_v43, %v1229_v0  ;;  %v1237_v60 = vld [vmem:[#allocation5 + $0xd8] sm:$0xff]  ;;  %v3434_v45 = vmul.f32 %v2704_v20, %v2999_v4 }
 0x362   : > { %v3476_v0 = vadd.s32 56, %v3013_v16 }
 0x363   : > { %v1375_v36 = vsel %vm406_vm2, %v1297_v7, 0.0  ;;  %v1363_v2 = vsel %vm406_vm2, %v1293_v24, 0.0  ;;  %v1433_v56 = vperm.slane %v3434_v45, 1 }
 0x364   : > { %v1263_v32 = vpop.permute.xlu0 %1262 }
 0x365   : > { %v1298_v28 = vmul.f32 %v1263_v32, %v1234_v57  ;;  %v1301_v37 = vmul.f32 %v1263_v32, %v1237_v60  ;;  %v1300_v35 = vmul.f32 %v1263_v32, %v1236_v39 }
 0x367   : > { %v1378_v41 = vsel %vm406_vm2, %v1298_v28, 0.0  ;;  %v1384_v38 = vsel %vm406_vm2, %v1300_v35, 0.0 }
 0x368   : > { %1334 = vadd.xlane.f32.xlu1 %v1333_v49  ;;  %1331 = vadd.xlane.f32.xlu0 %v1330_v48  ;;  %v1296_v49 = vmul.f32 %v1261_v8, %v1232_v62  ;;  %v1265_v48 = vpop.permute.xlu1 %1264 }
 0x369   : > { %1319 = vadd.xlane.f32.xlu2 %v1318_v52  ;;  %v1387_v52 = vsel %vm406_vm2, %v1301_v37, 0.0  ;;  %v1304_v30 = vmul.f32 %v1265_v48, %v1240_v50  ;;  %v1303_v19 = vmul.f32 %v1265_v48, %v1239_v51  ;;  %v1302_v42 = vmul.f32 %v1265_v48, %v1238_v40 }
 0x36a   : > { %v1372_v58 = vsel %vm406_vm2, %v1296_v49, 0.0  ;;  %v1305_v43 = vmul.f32 %v1265_v48, %v1241_v29  ;;  %v3562_v29 = vadd.s32 48, %v3013_v16 }
 0x36b   : > { %v1390_v25 = vsel %vm406_vm2, %v1302_v42, 0.0 }
 0x36c   : > { %v1399_v46 = vsel %vm406_vm2, %v1305_v43, 0.0 }
 0x370   : > { %1343 = vadd.xlane.f32.xlu1 %v1342_v15  ;;  %1340 = vadd.xlane.f32.xlu0 %v1339_v9  ;;  %v1299_v15 = vmul.f32 %v1263_v32, %v1235_v13  ;;  %v1396_v9 = vsel %vm406_vm2, %v1304_v30, 0.0  ;;  %v3530_v30 = vadd.s32 40, %v3013_v16 }
 0x371   : > { %1328 = vadd.xlane.f32.xlu2 %v1327_v1  ;;  %v1393_v1 = vsel %vm406_vm2, %v1303_v19, 0.0 }
 0x372   : > { %v1381_v63 = vsel %vm406_vm2, %v1299_v15, 0.0 }
 0x378   : > { %1352 = vadd.xlane.f32.xlu1 %v1351_v10  ;;  %1349 = vadd.xlane.f32.xlu0 %v1348_v14  ;;  %v1408_v10 = vperm.slane %v3434_v45, 0  ;;  %v3439_v14 = vperm.slane %v3434_v45, 3 }
 0x379   : > { %1337 = vadd.xlane.f32.xlu2 %v1336_v3  ;;  %v3445_v3 = vperm.slane %v3434_v45, 4 }
 0x380   : > { %1361 = vadd.xlane.f32.xlu1 %v1360_v61  ;;  %1358 = vadd.xlane.f32.xlu0 %v1357_v34  ;;  %v2706_v61 = vpop.eup %2705  ;;  %v3456_v34 = vperm.slane %v3434_v45, 5 }
 0x381   : > { %1346 = vadd.xlane.f32.xlu2 %v1345_v26  ;;  %v1675_v8 = vadd.f32 1.0, %v2706_v61  ;;  %v1458_v26 = vperm.slane %v3434_v45, 2 }
 0x383   : > { %2707 = vrcp.f32 %v1675_v8  ;;  %vm1681_vm9 = vweird.f32 %v1675_v8  ;;  %v1687_v32 = vand.u32 2147483648, %v1675_v8 }
 0x385   : > { %v1688_v27 = vor.u32 1.1754944e-38, %v1687_v32 }
 0x388   : > { %1370 = vadd.xlane.f32.xlu1 %v1369_v23  ;;  %1367 = vadd.xlane.f32.xlu0 %v1366_v55  ;;  %v3470_v55 = vperm.slane %v3434_v45, 6 }
 0x389   : > { %1355 = vadd.xlane.f32.xlu2 %v1354_v31  ;;  %v2708_v44 = vpop.eup %2707  ;;  %v1685_v31 = vand.u32 2147483647, %v1675_v8 }
 0x38a   : > { %v1677_v17 = vmul.f32 %v2708_v44, %v1675_v8  ;;  %vm1682_vm10 = vweird.f32 %v2708_v44 }
 0x38b   : > { %vm1683_vm11 = vmor %vm1681_vm9, %vm1682_vm10  ;;  %vm1686_vm12 = vcmp.eq.f32.partialorder %v1685_v31, 8.507059e+37 }
 0x38c   : > { %v1678_v11 = vsub.f32 1.0, %v1677_v17 }
 0x38e   : > { %v1679_v18 = vmul.f32 %v2708_v44, %v1678_v11  ;;  %v1583_v11 = vperm.slane %v3434_v45, 7 }
 0x390   : > { %1379 = vadd.xlane.f32.xlu1 %v1378_v41  ;;  %1376 = vadd.xlane.f32.xlu0 %v1375_v36  ;;  %v1680_v57 = vadd.f32 %v2708_v44, %v1679_v18 }
 0x391   : > { %1364 = vadd.xlane.f32.xlu2 %v1363_v2 }
 0x392   : > { %v1684_v28 = vsel %vm1683_vm11, %v2708_v44, %v1680_v57 }
 0x393   : > { %v1689_v24 = vsel %vm1686_vm12, %v1688_v27, %v1684_v28 }
 0x394   : > { %v3484_v36 = vmul.f32 %v1689_v24, %v2999_v4  ;;  %v3501_v4 = vadd.s32 32, %v3013_v16 }
 0x396   : > { %v3489_v60 = vperm.slane %v3484_v36, 3  ;;  %v3510_v48 = vperm.slane %v3484_v36, 0  ;;  %v3554_v42 = vperm.slane %v3484_v36, 6 }
 0x398   : > { %1388 = vadd.xlane.f32.xlu1 %v1387_v52  ;;  %1385 = vadd.xlane.f32.xlu0 %v1384_v38  ;;  %v3522_v38 = vperm.slane %v3484_v36, 5 }
 0x399   : > { %1373 = vadd.xlane.f32.xlu2 %v1372_v58 }
 0x3a0   : > { %1397 = vadd.xlane.f32.xlu1 %v1396_v9  ;;  %1394 = vadd.xlane.f32.xlu0 %v1393_v1  ;;  %v3542_v9 = vperm.slane %v3484_v36, 1 }
 0x3a1   : > { %1382 = vadd.xlane.f32.xlu2 %v1381_v63 }
 0x3a9   : > { %1391 = vadd.xlane.f32.xlu2 %v1390_v25 }
 0x3b1   : > { %1400 = vadd.xlane.f32.xlu2 %v1399_v46 }
 0x3b4   : > { %1413 = vperm.xlu0 %2642, %v1408_v10  }
 0x3b9   : > { %1419 = vperm.xlu1 %2643, %v1408_v10  }
 0x3bc   : > { %1488 = vperm.xlu0 %2642, %v3439_v14  }
 0x3c1   : > { %2645 = vset.pattern.permute.xlu1 %v3040_v47 }
 0x3c4   : > { %2657 = vset.pattern.permute.xlu0 %v3023_v22 }
 0x3c9   : > { %1425 = vperm.xlu2 %2644, %v1408_v10   ;;  %1431 = vperm.xlu1 %2645, %v1408_v10  }
 0x3cb   : > { %v3451_v33 = vpop.xlane.xlu0 %1310  ;;  %v3478_v7 = vpop.xlane.xlu1 %1313 }
 0x3cc   : > { %1519 = vperm.xlu0 %2657, %v3445_v3   ;;  %v3486_v2 = vpop.xlane.xlu2 %1307 }
 0x3d1   : > { %2646 = vset.pattern.permute.xlu2 %v3013_v16  ;;  %2647 = vset.pattern.permute.xlu1 %v3023_v22 }
 0x3d3   : > { %v3458_v53 = vpop.xlane.xlu0 %1322  ;;  %v3493_v39 = vpop.xlane.xlu1 %1325 }
 0x3d4   : > { %2662 = vset.pattern.permute.xlu0 %v3020_v21  ;;  %v3498_v37 = vpop.xlane.xlu2 %1316 }
 0x3d9   : > { %1438 = vperm.xlu2 %2646, %v1433_v56   ;;  %1444 = vperm.xlu1 %2647, %v1433_v56  }
 0x3db   : > { %v3465_v59 = vpop.xlane.xlu0 %1331  ;;  %v3505_v35 = vpop.xlane.xlu1 %1334 }
 0x3dc   : > { %1550 = vperm.xlu0 %2662, %v3456_v34   ;;  %v3514_v50 = vpop.xlane.xlu2 %1319 }
 0x3e1   : > { %2648 = vset.pattern.permute.xlu2 %v3020_v21  ;;  %2649 = vset.pattern.permute.xlu1 %v3013_v16 }
 0x3e3   : > { %v3467_v23 = vpop.xlane.xlu0 %1340  ;;  %v3517_v51 = vpop.xlane.xlu1 %1343 }
 0x3e4   : > { %2663 = vset.pattern.permute.xlu0 %v3040_v47  ;;  %v3526_v58 = vpop.xlane.xlu2 %1328 }
 0x3e9   : > { %1450 = vperm.xlu2 %2648, %v1433_v56   ;;  %1463 = vperm.xlu1 %2649, %v1458_v26  }
 0x3eb   : > { %v3480_v41 = vpop.xlane.xlu0 %1349  ;;  %v3532_v19 = vpop.xlane.xlu1 %1352 }
 0x3ec   : > { %1456 = vperm.xlu0 %2663, %v1433_v56   ;;  %v3539_v15 = vpop.xlane.xlu2 %1337 }
 0x3f1   : > { %2650 = vset.pattern.permute.xlu2 %v3023_v22  ;;  %2651 = vset.pattern.permute.xlu1 %v3020_v21 }
 0x3f3   : > { %v3495_v62 = vpop.xlane.xlu0 %1358  ;;  %v3546_v1 = vpop.xlane.xlu1 %1361 }
 0x3f4   : > { %1581 = vperm.xlu0 %2663, %v3470_v55   ;;  %v3551_v40 = vpop.xlane.xlu2 %1346 }
 0x3f9   : > { %1469 = vperm.xlu2 %2650, %v1458_v26   ;;  %1475 = vperm.xlu1 %2651, %v1458_v26  }
 0x3fb   : > { %v3507_v49 = vpop.xlane.xlu0 %1367  ;;  %v3559_v20 = vpop.xlane.xlu1 %1370 }
 0x3fc   : > { %2684 = vset.pattern.permute.xlu0 %v3476_v0  ;;  %v3566_v43 = vpop.xlane.xlu2 %1355 }
 0x401   : > { %2652 = vset.pattern.permute.xlu2 %v3040_v47  ;;  %2653 = vset.pattern.permute.xlu1 %v3023_v22 }
 0x403   : > { %v3519_v52 = vpop.xlane.xlu0 %1376  ;;  %v3571_v10 = vpop.xlane.xlu1 %1379 }
 0x404   : > { %1791 = vperm.xlu0 %2684, %v3489_v60   ;;  %3960 = vst [vmem:[#allocation18_spill] sm:$0xff] %v3519_v52  ;;  %v3578_v5 = vpop.xlane.xlu2 %1364 }
 0x409   : > { %1481 = vperm.xlu2 %2652, %v1458_v26   ;;  %1494 = vperm.xlu1 %2653, %v3439_v14   ;;  %v3596_v26 = vperm.slane %v3484_v36, 7 }
 0x40b   : > { %v3536_v13 = vpop.xlane.xlu0 %1385  ;;  %v3583_v6 = vpop.xlane.xlu1 %1388 }
 0x40c   : > { %2685 = vset.pattern.permute.xlu0 %v3501_v4  ;;  %3961 = vst [vmem:[#allocation19_spill] sm:$0xff] %v3536_v13  ;;  %v1374_v56 = vpop.xlane.xlu2 %1373 }
 0x40d   : > { %3963 = vst [vmem:[#allocation21_spill] sm:$0xff] %v3583_v6 }
 0x411   : > { %2654 = vset.pattern.permute.xlu2 %v3020_v21  ;;  %2655 = vset.pattern.permute.xlu1 %v3040_v47 }
 0x413   : > { %v3548_v63 = vpop.xlane.xlu0 %1394  ;;  %v3591_v44 = vpop.xlane.xlu1 %1397 }
 0x414   : > { %1698 = vperm.xlu0 %2685, %v3510_v48   ;;  %3962 = vst [vmem:[#allocation20_spill] sm:$0xff] %v3548_v63  ;;  %v3614_v57 = vpop.xlane.xlu2 %1382 }
 0x415   : > { %3965 = vst [vmem:[#allocation23_spill] sm:$0xff] %v3591_v44 }
 0x419   : > { %1500 = vperm.xlu2 %2654, %v3439_v14   ;;  %1506 = vperm.xlu1 %2655, %v3439_v14   ;;  %v3574_v14 = vperm.slane %v3484_v36, 2 }
 0x41c   : > { %1823 = vperm.xlu0 %2685, %v3522_v38   ;;  %v3622_v27 = vpop.xlane.xlu2 %1391 }
 0x41d   : > { %3967 = vst [vmem:[#allocation25_spill] sm:$0xff] %v3622_v27 }
 0x421   : > { %2656 = vset.pattern.permute.xlu2 %v3013_v16  ;;  %2658 = vset.pattern.permute.xlu1 %v3020_v21 }
 0x424   : > { %2690 = vset.pattern.permute.xlu0 %v3530_v30  ;;  %v3629_v24 = vpop.xlane.xlu2 %1400 }
 0x425   : > { %3968 = vst [vmem:[#allocation26_spill] sm:$0xff] %v3629_v24  ;;  %v1793_v24 = vperm.slane %v3484_v36, 4 }
 0x426   : > { %v1414_v25 = vpop.permute.xlu0 %1413 }
 0x429   : > { %1513 = vperm.xlu2 %2656, %v3445_v3   ;;  %1525 = vperm.xlu1 %2658, %v3445_v3  }
 0x42b   : > { %v3598_v17 = vpop.permute.xlu1 %1419 }
 0x42c   : > { %1729 = vperm.xlu0 %2690, %v3542_v9   ;;  %v3635_v44 = vpop.permute.xlu2 %1425  ;;  %v1641_v36 = vadd.f32 %v3598_v17, %v3451_v33 }
 0x42e   : > { %v3569_v46 = vpop.permute.xlu0 %1488 }
 0x431   : > { %2659 = vset.pattern.permute.xlu2 %v3040_v47  ;;  %2660 = vset.pattern.permute.xlu1 %v3013_v16 }
 0x434   : > { %1854 = vperm.xlu0 %2690, %v3554_v42  }
 0x439   : > { %1531 = vperm.xlu2 %2659, %v3445_v3   ;;  %1538 = vperm.xlu1 %2660, %v3456_v34  }
 0x43c   : > { %2695 = vset.pattern.permute.xlu0 %v3562_v29 }
 0x43e   : > { %v3581_v3 = vpop.permute.xlu0 %1519 }
 0x441   : > { %2661 = vset.pattern.permute.xlu2 %v3023_v22  ;;  %2664 = vset.pattern.permute.xlu1 %v3040_v47 }
 0x444   : > { %1760 = vperm.xlu0 %2695, %v3574_v14  }
 0x449   : > { %1544 = vperm.xlu2 %2661, %v3456_v34   ;;  %1556 = vperm.xlu1 %2664, %v3456_v34   ;;  %v3603_v34 = vpop.permute.xlu1 %1431 }
 0x44a   : > { %v1643_v17 = vadd.f32 %v3603_v34, %v3498_v37 }
 0x44c   : > { %1885 = vperm.xlu0 %2695, %v3596_v26  }
 0x44e   : > { %v1551_v61 = vpop.permute.xlu0 %1550 }
 0x44f   : > { %v3587_v8 = vadd.f32 %v1551_v61, %v1374_v56 }
 0x451   : > { %3964 = vst [vmem:[#allocation22_spill] sm:$0xff] %v3587_v8  ;;  %2665 = vset.pattern.permute.xlu2 %v3013_v16  ;;  %2666 = vset.pattern.permute.xlu1 %v3023_v22  ;;  %v3610_v32 = vpop.permute.xlu1 %1444 }
 0x454   : > { %2703 = vset.pattern.permute.xlu0 %v3948_v54 }
 0x459   : > { %1563 = vperm.xlu2 %2665, %v3470_v55   ;;  %1569 = vperm.xlu1 %2666, %v3470_v55  }
 0x45e   : > { %v3608_v18 = vpop.permute.xlu0 %1456 }
 0x45f   : > { %v1647_v37 = vadd.f32 %v3608_v18, %v3526_v58 }
 0x461   : > { %2667 = vset.pattern.permute.xlu2 %v3020_v21  ;;  %2668 = vset.pattern.permute.xlu1 %v3013_v16  ;;  %v3616_v16 = vpop.permute.xlu1 %1463 }
 0x466   : > { %v3618_v31 = vpop.permute.xlu0 %1581 }
 0x467   : > { %3966 = vst [vmem:[#allocation24_spill] sm:$0xff] %v3618_v31 }
 0x469   : > { %1575 = vperm.xlu2 %2667, %v3470_v55   ;;  %1588 = vperm.xlu1 %2668, %v1583_v11  }
 0x46b   : > { %v3620_v45 = vpop.permute.xlu1 %1475 }
 0x471   : > { %2669 = vset.pattern.permute.xlu2 %v3023_v22  ;;  %2670 = vset.pattern.permute.xlu1 %v3020_v21  ;;  %v1640_v21 = vadd.f32 %v1414_v25, %v3486_v2 }
 0x476   : > { %v1792_v55 = vpop.permute.xlu0 %1791 }
 0x479   : > { %1594 = vperm.xlu2 %2669, %v1583_v11   ;;  %1600 = vperm.xlu1 %2670, %v1583_v11  }
 0x47b   : > { %v3626_v22 = vpop.permute.xlu1 %1494 }
 0x481   : > { %2671 = vset.pattern.permute.xlu2 %v3040_v47  ;;  %2672 = vset.pattern.permute.xlu1 %v3530_v30  ;;  %v1439_v47 = vpop.permute.xlu2 %1438 }
 0x486   : > { %v1699_v28 = vpop.permute.xlu0 %1698 }
 0x487   : > { %v1925_v56 = vmul.f32 %v1699_v28, %v1640_v21 }
 0x489   : > { %1606 = vperm.xlu2 %2671, %v1583_v11   ;;  %1704 = vperm.xlu1 %2672, %v3510_v48   ;;  %v3643_v2 = vpop.permute.xlu2 %1450 }
 0x48b   : > { %v1507_v61 = vpop.permute.xlu1 %1506 }
 0x48c   : > { %v1655_v12 = vadd.f32 %v1507_v61, %v3532_v19 }
 0x48e   : > { %v3633_v54 = vmul.f32 %v1792_v55, %v1655_v12  ;;  %v1824_v55 = vpop.permute.xlu0 %1823 }
 0x491   : > { %2673 = vset.pattern.permute.xlu2 %v3562_v29  ;;  %2674 = vset.pattern.permute.xlu1 %v3476_v0  ;;  %v3649_v12 = vpop.permute.xlu2 %1469 }
 0x499   : > { %1710 = vperm.xlu2 %2673, %v3510_v48   ;;  %1716 = vperm.xlu1 %2674, %v3510_v48   ;;  %v3656_v21 = vpop.permute.xlu2 %1481 }
 0x49b   : > { %v3645_v19 = vpop.permute.xlu1 %1525 }
 0x4a1   : > { %2675 = vset.pattern.permute.xlu2 %v3501_v4  ;;  %2676 = vset.pattern.permute.xlu1 %v3562_v29  ;;  %v3660_v28 = vpop.permute.xlu2 %1500 }
 0x4a9   : > { %1723 = vperm.xlu2 %2675, %v3542_v9   ;;  %1735 = vperm.xlu1 %2676, %v3542_v9  }
 0x4ab   : > { %v1539_v25 = vpop.permute.xlu1 %1538 }
 0x4ac   : > { %v1660_v11 = vadd.f32 %v1539_v25, %v3507_v49  ;;  %v3664_v49 = vpop.permute.xlu2 %1513 }
 0x4ae   : > { %v3652_v48 = vmul.f32 %v1824_v55, %v1660_v11 }
 0x4b1   : > { %2677 = vset.pattern.permute.xlu2 %v3476_v0  ;;  %2678 = vset.pattern.permute.xlu1 %v3501_v4 }
 0x4b4   : > { %v3668_v61 = vpop.permute.xlu2 %1531 }
 0x4b9   : > { %1741 = vperm.xlu2 %2677, %v3542_v9   ;;  %1748 = vperm.xlu1 %2678, %v3574_v14  }
 0x4bb   : > { %v3678_v11 = vpop.permute.xlu1 %1556 }
 0x4bc   : > { %v3672_v9 = vpop.permute.xlu2 %1544  ;;  %3970 = vst [vmem:[#allocation28_spill] sm:$0xff] %v3678_v11 }
 0x4c1   : > { %2679 = vset.pattern.permute.xlu2 %v3530_v30  ;;  %2680 = vset.pattern.permute.xlu1 %v3476_v0 }
 0x4c4   : > { %v3676_v25 = vpop.permute.xlu2 %1563 }
 0x4c5   : > { %3969 = vst [vmem:[#allocation27_spill] sm:$0xff] %v3676_v25 }
 0x4c9   : > { %1754 = vperm.xlu2 %2679, %v3574_v14   ;;  %1766 = vperm.xlu1 %2680, %v3574_v14  }
 0x4cb   : > { %v3684_v55 = vpop.permute.xlu1 %1569 }
 0x4cc   : > { %v3682_v14 = vpop.permute.xlu2 %1575 }
 0x4cd   : > { %3971 = vst [vmem:[#allocation29_spill] sm:$0xff] %v3682_v14 }
 0x4d1   : > { %2681 = vset.pattern.permute.xlu2 %v3501_v4  ;;  %2682 = vset.pattern.permute.xlu1 %v3530_v30 }
 0x4d4   : > { %v3688_v27 = vpop.permute.xlu2 %1594 }
 0x4d5   : > { %3972 = vst [vmem:[#allocation30_spill] sm:$0xff] %v3688_v27  ;;  %v1730_v27 = vpop.permute.xlu0 %1729 }
 0x4d9   : > { %1773 = vperm.xlu2 %2681, %v3489_v60   ;;  %1779 = vperm.xlu1 %2682, %v3489_v60  }
 0x4db   : > { %v3690_v63 = vpop.permute.xlu1 %1588 }
 0x4dc   : > { %3973 = vst [vmem:[#allocation31_spill] sm:$0xff] %v3690_v63  ;;  %v1644_v63 = vadd.f32 %v1439_v47, %v3514_v50 }
 0x4e1   : > { %2683 = vset.pattern.permute.xlu2 %v3562_v29  ;;  %2686 = vset.pattern.permute.xlu1 %v3501_v4 }
 0x4e3   : > { %v3694_v13 = vpop.permute.xlu2 %1606 }
 0x4e4   : > { %3974 = vst [vmem:[#allocation32_spill] sm:$0xff] %v3694_v13  ;;  %v1645_v13 = vadd.f32 %v3610_v32, %v3458_v53 }
 0x4e6   : > { %v1930_v11 = vmul.f32 %v1730_v27, %v1645_v13 }
 0x4e9   : > { %1785 = vperm.xlu2 %2683, %v3489_v60   ;;  %1798 = vperm.xlu1 %2686, %v1793_v24  }
 0x4eb   : > { %v3696_v31 = vpop.permute.xlu1 %1600 }
 0x4ec   : > { %3975 = vst [vmem:[#allocation33_spill] sm:$0xff] %v3696_v31 }
 0x4f1   : > { %2687 = vset.pattern.permute.xlu2 %v3530_v30  ;;  %2688 = vset.pattern.permute.xlu1 %v3562_v29 }
 0x4f3   : > { %v1711_v14 = vpop.permute.xlu2 %1710 }
 0x4f9   : > { %1804 = vperm.xlu2 %2687, %v1793_v24   ;;  %1810 = vperm.xlu1 %2688, %v1793_v24  }
 0x4fb   : > { %v1705_v60 = vpop.permute.xlu1 %1704 }
 0x4fc   : > { %v1926_v6 = vmul.f32 %v1705_v60, %v1641_v36 }
 0x4fe   : > { %v3700_v8 = vpack.c.bf16 %v1926_v6, %v1925_v56  ;;  %v1642_v6 = vadd.f32 %v3635_v44, %v3478_v7  ;;  %v1646_v7 = vadd.f32 %v3643_v2, %v3493_v39  ;;  %v1649_v39 = vadd.f32 %v3649_v12, %v3505_v35  ;;  %v3736_v2 = vpop.permute.xlu0 %1854 }
 0x4ff   : > { %v1651_v35 = vadd.f32 %v3656_v21, %v3467_v23  ;;  %v1652_v23 = vadd.f32 %v3569_v46, %v3517_v51 }
 0x500   : > { %v1927_v56 = vmul.f32 %v1711_v14, %v1642_v6 }
 0x501   : > { %2689 = vset.pattern.permute.xlu2 %v3476_v0  ;;  %2691 = vset.pattern.permute.xlu1 %v3530_v30 }
 0x503   : > { %v1724_v31 = vpop.permute.xlu2 %1723 }
 0x504   : > { %v1929_v52 = vmul.f32 %v1724_v31, %v1644_v63 }
 0x506   : > { %v3707_v25 = vpack.c.bf16 %v1930_v11, %v1929_v52 }
 0x508   : > { %v1998_v33 = vunpack.c.h.b16 %v3707_v25  ;;  %v1997_v51 = vunpack.c.l.b16 %v3707_v25 }
 0x509   : > { %1816 = vperm.xlu2 %2689, %v1793_v24   ;;  %1829 = vperm.xlu1 %2691, %v3522_v38  }
 0x50a   : > { %2041 = vperm.xlu0 %2703, %v1998_v33  }
 0x50b   : > { %v1717_v50 = vpop.permute.xlu1 %1716 }
 0x50c   : > { %v1928_v53 = vmul.f32 %v1717_v50, %v1643_v17 }
 0x50e   : > { %v3715_v32 = vpack.c.bf16 %v1928_v53, %v1927_v56 }
 0x510   : > { %v1996_v52 = vunpack.c.h.b16 %v3715_v32 }
 0x511   : > { %2692 = vset.pattern.permute.xlu2 %v3562_v29  ;;  %2693 = vset.pattern.permute.xlu1 %v3476_v0 }
 0x512   : > { %2035 = vperm.xlu0 %2703, %v1996_v52  }
 0x513   : > { %v1742_v13 = vpop.permute.xlu2 %1741 }
 0x514   : > { %v1932_v44 = vmul.f32 %v1742_v13, %v1647_v37 }
 0x519   : > { %1835 = vperm.xlu2 %2692, %v3522_v38   ;;  %1841 = vperm.xlu1 %2693, %v3522_v38   ;;  %v1648_v38 = vadd.f32 %v3616_v16, %v3465_v59  ;;  %v1650_v59 = vadd.f32 %v3620_v45, %v3539_v15  ;;  %v1653_v15 = vadd.f32 %v3626_v22, %v3551_v40  ;;  %v1995_v40 = vunpack.c.l.b16 %v3715_v32 }
 0x51a   : > { %v1657_v22 = vadd.f32 %v3581_v3, %v3495_v62 }
 0x51b   : > { %v1736_v63 = vpop.permute.xlu1 %1735 }
 0x51c   : > { %v1931_v34 = vmul.f32 %v1736_v63, %v1646_v7 }
 0x51e   : > { %v3726_v31 = vpack.c.bf16 %v1932_v44, %v1931_v34 }
 0x520   : > { %v1999_v52 = vunpack.c.l.b16 %v3726_v31  ;;  %v2000_v62 = vunpack.c.h.b16 %v3726_v31  ;;  %v1661_v31 = vadd.f32 %v3672_v9, %v3559_v20 }
 0x521   : > { %2694 = vset.pattern.permute.xlu2 %v3501_v4  ;;  %2696 = vset.pattern.permute.xlu1 %v3562_v29  ;;  %v1761_v29 = vpop.permute.xlu0 %1760 }
 0x522   : > { %v1935_v11 = vmul.f32 %v1761_v29, %v1650_v59  ;;  %v3977_v29 = vld [vmem:[#allocation27_spill] sm:$0xff] }
 0x523   : > { %v1755_v27 = vpop.permute.xlu2 %1754 }
 0x524   : > { %v1934_v18 = vmul.f32 %v1755_v27, %v1649_v39 }
 0x529   : > { %1848 = vperm.xlu2 %2694, %v3554_v42   ;;  %1860 = vperm.xlu1 %2696, %v3554_v42  }
 0x52b   : > { %v1749_v58 = vpop.permute.xlu1 %1748 }
 0x52c   : > { %v1933_v24 = vmul.f32 %v1749_v58, %v1648_v38  ;;  %v1665_v58 = vadd.f32 %v3684_v55, %v3614_v57 }
 0x52e   : > { %v1961_v47 = vpack.c.bf16 %v1934_v18, %v1933_v24  ;;  %v1950_v9 = vmul.f32 %v3736_v2, %v1665_v58 }
 0x530   : > { %v2001_v25 = vunpack.c.l.b16 %v1961_v47  ;;  %v2002_v32 = vunpack.c.h.b16 %v1961_v47 }
 0x531   : > { %2697 = vset.pattern.permute.xlu2 %v3476_v0  ;;  %2698 = vset.pattern.permute.xlu1 %v3501_v4  ;;  %v1654_v4 = vadd.f32 %v3660_v28, %v3480_v41  ;;  %v1993_v41 = vunpack.c.l.b16 %v3700_v8  ;;  %v1994_v28 = vunpack.c.h.b16 %v3700_v8  ;;  %v1656_v8 = vadd.f32 %v3664_v49, %v3566_v43 }
 0x532   : > { %v1659_v43 = vadd.f32 %v3668_v61, %v3578_v5  ;;  %v1658_v49 = vadd.f32 %v3645_v19, %v3546_v1 }
 0x533   : > { %v1774_v16 = vpop.permute.xlu2 %1773 }
 0x534   : > { %v1937_v45 = vmul.f32 %v1774_v16, %v1652_v23 }
 0x539   : > { %1866 = vperm.xlu2 %2697, %v3554_v42   ;;  %1873 = vperm.xlu1 %2698, %v3596_v26  }
 0x53b   : > { %v1767_v12 = vpop.permute.xlu1 %1766 }
 0x53c   : > { %v1936_v14 = vmul.f32 %v1767_v12, %v1651_v35  ;;  %v1664_v35 = vadd.f32 %v3977_v29, %v3571_v10 }
 0x53e   : > { %v1962_v36 = vpack.c.bf16 %v1936_v14, %v1935_v11  ;;  %v3978_v14 = vld [vmem:[#allocation18_spill] sm:$0xff] }
 0x540   : > { %v2003_v34 = vunpack.c.l.b16 %v1962_v36  ;;  %v2004_v39 = vunpack.c.h.b16 %v1962_v36  ;;  %v3979_v36 = vld [vmem:[#allocation28_spill] sm:$0xff] }
 0x541   : > { %2699 = vset.pattern.permute.xlu2 %v3530_v30  ;;  %2700 = vset.pattern.permute.xlu1 %v3476_v0  ;;  %v1663_v57 = vadd.f32 %v3979_v36, %v3978_v14 }
 0x543   : > { %v1786_v42 = vpop.permute.xlu2 %1785 }
 0x544   : > { %v1939_v60 = vmul.f32 %v1786_v42, %v1654_v4  ;;  %v3980_v4 = vld [vmem:[#allocation22_spill] sm:$0xff] }
 0x546   : > { %v1964_v33 = vpack.c.bf16 %v3633_v54, %v1939_v60  ;;  %v3976_v54 = vmov 0  }
 0x548   : > { %v2008_v13 = vunpack.c.h.b16 %v1964_v33 }
 0x549   : > { %1879 = vperm.xlu2 %2699, %v3596_v26   ;;  %1891 = vperm.xlu1 %2700, %v3596_v26   ;;  %v2007_v26 = vunpack.c.l.b16 %v1964_v33 }
 0x54b   : > { %v1780_v30 = vpop.permute.xlu1 %1779 }
 0x54c   : > { %v1938_v0 = vmul.f32 %v1780_v30, %v1653_v15  ;;  %v3981_v30 = vld [vmem:[#allocation21_spill] sm:$0xff] }
 0x54e   : > { %v1963_v21 = vpack.c.bf16 %v1938_v0, %v1937_v45  ;;  %v3982_v45 = vld [vmem:[#allocation24_spill] sm:$0xff] }
 0x54f   : > { %v1667_v0 = vadd.f32 %v3982_v45, %v3981_v30 }
 0x550   : > { %v2005_v6 = vunpack.c.l.b16 %v1963_v21  ;;  %v2006_v27 = vunpack.c.h.b16 %v1963_v21  ;;  %v3983_v21 = vld [vmem:[#allocation19_spill] sm:$0xff] }
 0x551   : > { %2701 = vset.pattern.permute.xlu2 %v3976_v54  ;;  %2702 = vset.pattern.permute.xlu1 %v3976_v54 }
 0x552   : > { %2026 = vperm.xlu2 %2701, %v1993_v41   ;;  %2029 = vperm.xlu1 %2702, %v1994_v28   ;;  %v3984_v41 = vld [vmem:[#allocation29_spill] sm:$0xff] }
 0x553   : > { %2062 = vperm.xlu0 %2703, %v2005_v6   ;;  %v1805_v46 = vpop.permute.xlu2 %1804  ;;  %v1666_v28 = vadd.f32 %v3984_v41, %v3983_v21 }
 0x554   : > { %v1942_v50 = vmul.f32 %v1805_v46, %v1657_v22 }
 0x55a   : > { %2038 = vperm.xlu2 %2701, %v1997_v51   ;;  %2032 = vperm.xlu1 %2702, %v1995_v40  }
 0x55b   : > { %2068 = vperm.xlu0 %2703, %v2007_v26   ;;  %v1799_v17 = vpop.permute.xlu1 %1798 }
 0x55c   : > { %v1941_v56 = vmul.f32 %v1799_v17, %v1656_v8  ;;  %v3985_v8 = vld [vmem:[#allocation20_spill] sm:$0xff]  ;;  %v3986_v17 = vld [vmem:[#allocation30_spill] sm:$0xff] }
 0x55e   : > { %v1965_v53 = vpack.c.bf16 %v1942_v50, %v1941_v56  ;;  %v1669_v50 = vadd.f32 %v3986_v17, %v3985_v8  ;;  %v3987_v56 = vld [vmem:[#allocation25_spill] sm:$0xff] }
 0x560   : > { %v2009_v38 = vunpack.c.l.b16 %v1965_v53  ;;  %v2010_v18 = vunpack.c.h.b16 %v1965_v53  ;;  %v3988_v53 = vld [vmem:[#allocation31_spill] sm:$0xff] }
 0x562   : > { %2044 = vperm.xlu2 %2701, %v1999_v52   ;;  %2050 = vperm.xlu1 %2702, %v2001_v25   ;;  %v1668_v52 = vadd.f32 %v3988_v53, %v3987_v56  ;;  %v2433_v56 = vld [vmem:[%s3939_s7] sm:$0xff] }
 0x563   : > { %2071 = vperm.xlu0 %2703, %v2008_v13   ;;  %v1817_v3 = vpop.permute.xlu2 %1816 }
 0x564   : > { %v1944_v37 = vmul.f32 %v1817_v3, %v1659_v43 }
 0x56a   : > { %2053 = vperm.xlu2 %2701, %v2002_v32   ;;  %2047 = vperm.xlu1 %2702, %v2000_v62  }
 0x56b   : > { %v1811_v7 = vpop.permute.xlu1 %1810 }
 0x56c   : > { %v1943_v63 = vmul.f32 %v1811_v7, %v1658_v49  ;;  %v1886_v7 = vpop.permute.xlu0 %1885 }
 0x56e   : > { %v1966_v44 = vpack.c.bf16 %v1944_v37, %v1943_v63  ;;  %v3989_v37 = vlaneseq }
 0x570   : > { %v2011_v47 = vunpack.c.l.b16 %v1966_v44  ;;  %v3793_v63 = vand.u32 127, %v3989_v37 }
 0x572   : > { %2056 = vperm.xlu2 %2701, %v2003_v34   ;;  %2065 = vperm.xlu1 %2702, %v2006_v27   ;;  %v3990_v34 = vld [vmem:[#allocation23_spill] sm:$0xff]  ;;  %v3991_v27 = vld [vmem:[#allocation33_spill] sm:$0xff] }
 0x573   : > { %v1836_v5 = vpop.permute.xlu2 %1835 }
 0x574   : > { %v1947_v10 = vmul.f32 %v1836_v5, %v3980_v4  ;;  %v3801_v5 = vadd.s32 4294967280, %v3793_v63 }
 0x57a   : > { %2059 = vperm.xlu2 %2701, %v2004_v39   ;;  %2074 = vperm.xlu1 %2702, %v2009_v38   ;;  %v1670_v39 = vadd.f32 %v3991_v27, %v3990_v34  ;;  %v3798_v38 = vadd.s32 4294967288, %v3793_v63 }
 0x57b   : > { %v1830_v61 = vpop.permute.xlu1 %1829 }
 0x57c   : > { %v1946_v1 = vmul.f32 %v1830_v61, %v1661_v31  ;;  %v2042_v31 = vpop.permute.xlu0 %2041  ;;  %v3992_v61 = vld [vmem:[#allocation26_spill] sm:$0xff] }
 0x57e   : > { %v1967_v19 = vpack.c.bf16 %v1946_v1, %v3652_v48  ;;  %v2012_v48 = vunpack.c.h.b16 %v1966_v44  ;;  %v3993_v1 = vld [vmem:[#allocation32_spill] sm:$0xff] }
 0x580   : > { %v2014_v24 = vunpack.c.h.b16 %v1967_v19  ;;  %v2013_v12 = vunpack.c.l.b16 %v1967_v19  ;;  %v1671_v19 = vadd.f32 %v3993_v1, %v3992_v61 }
 0x582   : > { %2077 = vperm.xlu2 %2701, %v2010_v18   ;;  %2089 = vperm.xlu0 %2703, %v2014_v24   ;;  %v1955_v24 = vmul.f32 %v1886_v7, %v1670_v39 }
 0x583   : > { %2080 = vperm.xlu1 %2702, %v2011_v47   ;;  %v1849_v20 = vpop.permute.xlu2 %1848  ;;  %v2137_v47 = vperm.slane %v2042_v31, %v3798_v38 }
 0x584   : > { %v1949_v59 = vmul.f32 %v1849_v20, %v1664_v35 }
 0x586   : > { %v1969_v16 = vpack.c.bf16 %v1950_v9, %v1949_v59 }
 0x588   : > { %v2017_v11 = vunpack.c.l.b16 %v1969_v16  ;;  %v2018_v23 = vunpack.c.h.b16 %v1969_v16 }
 0x58a   : > { %2086 = vperm.xlu2 %2701, %v2013_v12   ;;  %2098 = vperm.xlu0 %2703, %v2017_v11  }
 0x58b   : > { %2083 = vperm.xlu1 %2702, %v2012_v48   ;;  %v1842_v55 = vpop.permute.xlu1 %1841 }
 0x58c   : > { %v1948_v42 = vmul.f32 %v1842_v55, %v1663_v57 }
 0x58e   : > { %v1968_v60 = vpack.c.bf16 %v1948_v42, %v1947_v10 }
 0x590   : > { %v2015_v33 = vunpack.c.l.b16 %v1968_v60  ;;  %v2016_v2 = vunpack.c.h.b16 %v1968_v60  ;;  %v3816_v60 = vadd.s32 4294967272, %v3793_v63 }
 0x592   : > { %2092 = vperm.xlu2 %2701, %v2015_v33   ;;  %v2036_v33 = vpop.permute.xlu0 %2035 }
 0x593   : > { %2101 = vperm.xlu1 %2702, %v2018_v23   ;;  %v1867_v15 = vpop.permute.xlu2 %1866 }
 0x594   : > { %v1952_v54 = vmul.f32 %v1867_v15, %v1667_v0 }
 0x59a   : > { %2095 = vperm.xlu2 %2701, %v2016_v2   ;;  %v2133_v2 = vperm.slane %v2036_v33, %v3816_v60 }
 0x59b   : > { %v1861_v6 = vpop.permute.xlu1 %1860 }
 0x59c   : > { %v1951_v51 = vmul.f32 %v1861_v6, %v1666_v28 }
 0x59e   : > { %v1970_v40 = vpack.c.bf16 %v1952_v54, %v1951_v51 }
 0x5a0   : > { %v2019_v46 = vunpack.c.l.b16 %v1970_v40  ;;  %v2020_v22 = vunpack.c.h.b16 %v1970_v40 }
 0x5a2   : > { %2104 = vperm.xlu0 %2703, %v2019_v46  }
 0x5a3   : > { %v1880_v26 = vpop.permute.xlu2 %1879 }
 0x5a4   : > { %v1954_v13 = vmul.f32 %v1880_v26, %v1669_v50  ;;  %v2434_v50 = vld [vmem:[%s3939_s7 + $0x8] sm:$0xff] }
 0x5a5   : > { %2221 = vmatpush.bf16.msra.mxu2 %v2434_v50  ;;  %v2231_v50 = vld [vmem:[#allocation3 + $0x10] sm:$0xff] }
 0x5a6   : > { %2235 = vst.msk [vmem:[%s2988_s29 + $0x10] sm:$0xff] %vm406_vm2, %v2231_v50 }
 0x5a9   : > { %2222 = vmatpush.bf16.msra.mxu2 %v2433_v56  ;;  %v2232_v56 = vld [vmem:[#allocation3 + $0x18] sm:$0xff] }
 0x5aa   : > { %2107 = vperm.xlu0 %2703, %v2020_v22   ;;  %2236 = vst.msk [vmem:[%s2988_s29 + $0x18] sm:$0xff] %vm406_vm2, %v2232_v56 }
 0x5ab   : > { %v1874_v25 = vpop.permute.xlu1 %1873 }
 0x5ac   : > { %v1953_v32 = vmul.f32 %v1874_v25, %v1668_v52  ;;  %v2027_v62 = vpop.permute.xlu2 %2026 }
 0x5ad   : > { %v2123_v14 = vperm.slane %v2027_v62, %v3793_v63 }
 0x5ae   : > { %v1971_v3 = vpack.c.bf16 %v1954_v13, %v1953_v32 }
 0x5b0   : > { %v2022_v43 = vunpack.c.h.b16 %v1971_v3  ;;  %v2021_v49 = vunpack.c.l.b16 %v1971_v3 }
 0x5b2   : > { %2113 = vperm.xlu2 %2701, %v2022_v43   ;;  %2110 = vperm.xlu1 %2702, %v2021_v49  }
 0x5b4   : > { %v2039_v44 = vpop.permute.xlu2 %2038 }
 0x5b5   : > { %v2136_v58 = vperm.slane %v2039_v44, %v3793_v63 }
 0x5b7   : > { %v2138_v9 = vsel %vm2126_vm13, %v2137_v47, %v2136_v58 }
 0x5bb   : > { %v1892_v18 = vpop.permute.xlu1 %1891 }
 0x5bc   : > { %v1956_v29 = vmul.f32 %v1892_v18, %v1671_v19  ;;  %v2045_v35 = vpop.permute.xlu2 %2044 }
 0x5bd   : > { %v2139_v20 = vperm.slane %v2045_v35, %v3801_v5 }
 0x5be   : > { %v1972_v59 = vpack.c.bf16 %v1956_v29, %v1955_v24 }
 0x5bf   : > { %v2140_v16 = vsel %vm2130_vm14, %v2139_v20, %v2138_v9 }
 0x5c0   : > { %v2023_v12 = vunpack.c.l.b16 %v1972_v59  ;;  %v2024_v11 = vunpack.c.h.b16 %v1972_v59 }
 0x5c2   : > { %2119 = vperm.xlu2 %2701, %v2024_v11   ;;  %2116 = vperm.xlu1 %2702, %v2023_v12  }
 0x5c4   : > { %v2030_v48 = vpop.permute.xlu1 %2029  ;;  %v2054_v21 = vpop.permute.xlu2 %2053 }
 0x5c5   : > { %v2125_v36 = vperm.slane %v2030_v48, %v3798_v38  ;;  %v2063_v28 = vpop.permute.xlu0 %2062  ;;  %v2144_v49 = vperm.slane %v2054_v21, %v3798_v38 }
 0x5c6   : > { %v2150_v7 = vperm.slane %v2063_v28, %v3793_v63 }
 0x5c7   : > { %v2127_v57 = vsel %vm2126_vm13, %v2125_v36, %v2123_v14 }
 0x5cc   : > { %v2033_v55 = vpop.permute.xlu1 %2032  ;;  %v2057_v41 = vpop.permute.xlu2 %2056 }
 0x5cd   : > { %v2129_v4 = vperm.slane %v2033_v55, %v3801_v5  ;;  %v2069_v51 = vpop.permute.xlu0 %2068  ;;  %v2146_v44 = vperm.slane %v2057_v41, %v3801_v5 }
 0x5ce   : > { %v2153_v27 = vperm.slane %v2069_v51, %v3801_v5 }
 0x5cf   : > { %v2131_v10 = vsel %vm2130_vm14, %v2129_v4, %v2127_v57 }
 0x5d0   : > { %v2135_v30 = vsel %vm2134_vm15, %v2133_v2, %v2131_v10 }
 0x5d4   : > { %v2051_v42 = vpop.permute.xlu1 %2050  ;;  %v2060_v6 = vpop.permute.xlu2 %2059 }
 0x5d5   : > { %v2072_v26 = vpop.permute.xlu0 %2071  ;;  %v2143_v3 = vperm.slane %v2051_v42, %v3793_v63  ;;  %v2148_v18 = vperm.slane %v2060_v6, %v3816_v60 }
 0x5d6   : > { %v2155_v35 = vperm.slane %v2072_v26, %v3816_v60 }
 0x5d7   : > { %v2145_v37 = vsel %vm2126_vm13, %v2144_v49, %v2143_v3 }
 0x5d8   : > { %v2147_v61 = vsel %vm2130_vm14, %v2146_v44, %v2145_v37 }
 0x5d9   : > { %v2149_v59 = vsel %vm2134_vm15, %v2148_v18, %v2147_v61 }
 0x5dc   : > { %v2048_v23 = vpop.permute.xlu1 %2047  ;;  %v2078_v40 = vpop.permute.xlu2 %2077 }
 0x5dd   : > { %v2141_v15 = vperm.slane %v2048_v23, %v3816_v60  ;;  %v2158_v24 = vperm.slane %v2078_v40, %v3798_v38 }
 0x5df   : > { %v2142_v45 = vsel %vm2134_vm15, %v2141_v15, %v2140_v16 }
 0x5e0   : > { %v2186_v0 = vsel %vm2185_vm0, %v2142_v45, %v2135_v30 }
 0x5e1   : > { %v2188_v42 = vsel %vm2187_vm1, %v2149_v59, %v2186_v0 }
 0x5e4   : > { %v2066_v54 = vpop.permute.xlu1 %2065  ;;  %v2087_v22 = vpop.permute.xlu2 %2086 }
 0x5e5   : > { %v2151_v43 = vperm.slane %v2066_v54, %v3798_v38  ;;  %v2164_v20 = vperm.slane %v2087_v22, %v3793_v63 }
 0x5e7   : > { %v2152_v34 = vsel %vm2126_vm13, %v2151_v43, %v2150_v7 }
 0x5e8   : > { %v2154_v47 = vsel %vm2130_vm14, %v2153_v27, %v2152_v34 }
 0x5e9   : > { %v2156_v11 = vsel %vm2134_vm15, %v2155_v35, %v2154_v47 }
 0x5ea   : > { %v2190_v2 = vsel %vm2189_vm4, %v2156_v11, %v2188_v42 }
 0x5ec   : > { %v2075_v46 = vpop.permute.xlu1 %2074  ;;  %v2093_v53 = vpop.permute.xlu2 %2092 }
 0x5ed   : > { %v2157_v39 = vperm.slane %v2075_v46, %v3793_v63  ;;  %v2167_v57 = vperm.slane %v2093_v53, %v3801_v5 }
 0x5ef   : > { %v2159_v16 = vsel %vm2126_vm13, %v2158_v24, %v2157_v39 }
 0x5f4   : > { %v2090_v17 = vpop.permute.xlu0 %2089  ;;  %v2096_v13 = vpop.permute.xlu2 %2095 }
 0x5f5   : > { %v2081_v8 = vpop.permute.xlu1 %2080  ;;  %v2165_v1 = vperm.slane %v2090_v17, %v3798_v38  ;;  %v2169_v45 = vperm.slane %v2096_v13, %v3816_v60  ;;  %v2229_v17 = vld [vmem:[#allocation3] sm:$0xff] }
 0x5f6   : > { %v2160_v19 = vperm.slane %v2081_v8, %v3801_v5  ;;  %2233 = vst.msk [vmem:[%s2988_s29] sm:$0xff] %vm406_vm2, %v2229_v17 }
 0x5f7   : > { %v2166_v48 = vsel %vm2126_vm13, %v2165_v1, %v2164_v20 }
 0x5f8   : > { %v2161_v14 = vsel %vm2130_vm14, %v2160_v19, %v2159_v16  ;;  %v2168_v23 = vsel %vm2130_vm14, %v2167_v57, %v2166_v48 }
 0x5f9   : > { %v2170_v54 = vsel %vm2134_vm15, %v2169_v45, %v2168_v23 }
 0x5fc   : > { %v2099_v25 = vpop.permute.xlu0 %2098 }
 0x5fd   : > { %v2084_v52 = vpop.permute.xlu1 %2083  ;;  %v2171_v4 = vperm.slane %v2099_v25, %v3793_v63 }
 0x5fe   : > { %v2162_v29 = vperm.slane %v2084_v52, %v3816_v60 }
 0x600   : > { %v2163_v55 = vsel %vm2134_vm15, %v2162_v29, %v2161_v14 }
 0x601   : > { %v2192_v21 = vsel %vm2191_vm5, %v2163_v55, %v2190_v2 }
 0x602   : > { %v2194_v46 = vsel %vm2193_vm6, %v2170_v54, %v2192_v21 }
 0x605   : > { %v2102_v32 = vpop.permute.xlu1 %2101 }
 0x606   : > { %v2172_v12 = vperm.slane %v2102_v32, %v3798_v38 }
 0x608   : > { %v2173_v15 = vsel %vm2126_vm13, %v2172_v12, %v2171_v4 }
 0x60c   : > { %v2114_v31 = vpop.permute.xlu2 %2113 }
 0x60d   : > { %v2179_v41 = vperm.slane %v2114_v31, %v3798_v38 }
 0x614   : > { %v2105_v62 = vpop.permute.xlu0 %2104 }
 0x615   : > { %v2174_v36 = vperm.slane %v2105_v62, %v3801_v5 }
 0x617   : > { %v2175_v28 = vsel %vm2130_vm14, %v2174_v36, %v2173_v15 }
 0x61c   : > { %v2108_v9 = vpop.permute.xlu0 %2107  ;;  %v2120_v30 = vpop.permute.xlu2 %2119 }
 0x61d   : > { %v2176_v10 = vperm.slane %v2108_v9, %v3816_v60  ;;  %v2183_v51 = vperm.slane %v2120_v30, %v3816_v60  ;;  %v2230_v60 = vld [vmem:[#allocation3 + $0x8] sm:$0xff] }
 0x61e   : > { %2234 = vst.msk [vmem:[%s2988_s29 + $0x8] sm:$0xff] %vm406_vm2, %v2230_v60  ;;  %s2753_s29 = sshra.s32 %s2260_s26, 4  ;;  %s2754_s29 = int_to_ptr.hbm [resolvable:$true] %s2753_s29 }
 0x61f   : > { %v2177_v0 = vsel %vm2134_vm15, %v2176_v10, %v2175_v28  ;;  %s2755_s13 = scalar_lea.hbm %s2754_s29, 8  ;;  %p2760_p10 = scmp.lt.s32.totalorder %s2754_s29, %s3940_s8 }
 0x620   : > { %p2756_p6 = scmp.ne.s32.totalorder %s2754_s29, %s2755_s13  ;;  %p2761_p11 = scmp.lt.s32.totalorder %s2759_s19, %s2755_s13 }
 0x622   : > { %p2757_p7 = pnand %p2756_p6, %p2954_p3  ;;  %p2762_p12 = por %p2761_p11, %p2760_p10 }
 0x624   : > { %v2111_v58 = vpop.permute.xlu1 %2110  ;;  %p2758_p9 = pneg %p2757_p7 }
 0x625   : > { %v2178_v33 = vperm.slane %v2111_v58, %v3793_v63 }
 0x626   : > { %p2763_p13 = pnand %p2762_p12, %p2758_p9 }
 0x627   : > { %v2180_v40 = vsel %vm2126_vm13, %v2179_v41, %v2178_v33 }
 0x634   : > { %v2117_v6 = vpop.permute.xlu1 %2116 }
 0x635   : > { %v2181_v63 = vperm.slane %v2117_v6, %v3801_v5  ;;  %v2196_v5 = vsel %vm2195_vm7, %v2177_v0, %v2194_v46 }
 0x637   : > { %v2182_v38 = vsel %vm2130_vm14, %v2181_v63, %v2180_v40 }
 0x638   : > { %v2184_v26 = vsel %vm2134_vm15, %v2183_v51, %v2182_v38 }
 0x639   : > { %v2198_v22 = vsel %vm2197_vm8, %v2184_v26, %v2196_v5 }
 0x63a   : > { %v2199_v8 = vpack.c.b16 %v2198_v22, %v2198_v22 }
 0x63c   : > { %2423 = vmatmul.msk.bf16.vlgmr.msra.gmra.mxu2 %vm423_vm3, %v2199_v8 }
 0x6bf   : > { %v2224_v53 = vpop.f32.mrf.mxu2 }
 0x6c0   : > { %2228 = vst.msk [vmem:[%s363_s11] sm:$0xff] %vm406_vm2, %v2224_v53 }
 0x6c1   : > { %2766 = shalt.err (!%p2763_p13)
}
 0x6c2   : > { %2439 = dma.vmem_to_hbm [thread:$0]  (%p2954_p3), %s2258_s14, 128, %s2260_s26, %s2238_s27  }
 0x6c7   : > { %v2226_v52 = vpop.f32.mrf.mxu2 }
 0x6c8 PF: > { %p2451_p0 = scmp.ge.s32.totalorder %s2841_s16, 2  ;;  %s2274_s11 = sand.u32 1, %s2813_s30  }
 0x6c9   : > { %s2275_s17 = scalar_lea.sflag [#allocation8], %s2274_s11 }
 0x6ca   : > { %p2446_p1 = pnand %p2451_p0, %p2963_p8 }
 0x6cc   : > { %p2447_p2 = pneg %p2446_p1 }
 0x6ce   : > { %2808 = dma.done.wait (%p2447_p2), %s2275_s17, 128  }
 0x6cf   : > { %2810 = vsyncadd (%p2447_p2), %s2275_s17, 4294967168  ;;  %s24_s16 = sadd.s32 1, %s2841_s16   ;;  %s3994_s21 = sld [smem:[#allocation12_spill]] }
 0x6d0   : > { %p21_p4 = scmp.ge.s32.totalorder %s24_s16, 6   ;;  %s3995_s11 = sld [smem:[#allocation17_spill]] }
 0x6d1   : > { %s3996_s12 = sld [smem:[#allocation13_spill]]  ;;  %s4000_s30 = smov %s2817_s10 }
 0x6d2   : > { %s3997_s13 = sld [smem:[#allocation14_spill]]  ;;  %23 = sbr.rel (!%p21_p4) target bundleno = 8 (0x8), region = 128 }
 0x6d3   : > { %s3998_s14 = sld [smem:[#allocation15_spill]] }
 0x6d4   : > { %s3999_s15 = sld [smem:[#allocation16_spill]] }
 0x6d5   : > { %s4001_s10 = smov %s3994_s21 }
 0x6d7   :  { %2289 = vsyncpa [#allocation7], 1 }
 0x6d8   :  { %2291 = vsyncpa [#allocation7 + $0x1], 1 }
 0x6d9   :  { %2292 = vsyncpa [#allocation8], 1 }
 0x6da   :  { %2294 = vsyncpa [#allocation8 + $0x1], 1 }

</bundles_post_ra>
